<compile_context>
chip_gen: v7x
topology: tpu7x:2x2x1
jax: 0.10.0
libtpu: 0.0.40
codegen_flags: <defaults>
</compile_context>

<pallas_src>
from functools import partial

import jax
import jax.numpy as jnp
from jax import lax
from jax.experimental import pallas as pl
from jax.experimental.pallas import tpu as pltpu


# -----------------------------------------------------------------------------
# Weight folding: nearest-2x-upsample-then-3x3-conv, output parity (a, b),
# i.e. y[2i+a, 2j+b], only touches 2x2 distinct shifted views of the (padded)
# original image; taps sharing the same shift can have their weights summed.
#   parity a, row-offset dr -> folded over kh in _TAPS[(a, dr)]
#   patch row start (into the 1-padded input) = (a + 1) // 2 + dr
# -----------------------------------------------------------------------------
_TAPS = {(0, 0): (0,), (0, 1): (1, 2), (1, 0): (0, 1), (1, 1): (2,)}


def _fold_weights(w_oihw, compute_dtype):
    """(Cout, Cin, 3, 3) OIHW -> folded (2, 2, 2, 2, Cin, Cout) [a, b, dr, dc]."""
    w = jnp.transpose(w_oihw, (2, 3, 1, 0)).astype(jnp.float32)  # (3, 3, Cin, Cout)
    cin = w.shape[2]
    blocks = []
    for a in range(2):
        for b in range(2):
            for dr in range(2):
                for dc in range(2):
                    acc = jnp.zeros_like(w[0, 0])
                    for kh in _TAPS[(a, dr)]:
                        for kw in _TAPS[(b, dc)]:
                            acc = acc + w[kh, kw]
                    blocks.append(acc)
    wf = jnp.stack(blocks, 0).reshape(2, 2, 2, 2, cin, w.shape[3])
    return wf.astype(compute_dtype)


# -----------------------------------------------------------------------------
# Kernels
# -----------------------------------------------------------------------------
def _upsample_conv_kernel(xp_ref, wf_ref, b_ref, o_ref):
    """Fused nearest-2x upsample + 3x3 'same' conv for one (batch, row-tile).

    xp_ref: (1, H+2, W+2, C)        zero-padded NHWC input (resident per batch)
    wf_ref: (2, 2, 2, 2, C, C)      folded parity weights [a, b, dr, dc]
    b_ref : (1, C)                  bias (f32)
    o_ref : (1, 2, 2, TH, W, C)     parity output for this row tile:
            o[0, a, b, i, j, :] == y[2*(t*TH + i) + a, 2*j + b, :]
    """
    th, w, c = o_ref.shape[3], o_ref.shape[4], o_ref.shape[5]
    row0 = pl.multiple_of(pl.program_id(1) * th, th)

    # Row slab for this tile: rows [row0, row0 + TH + 2) of the padded input.
    slab = xp_ref[0, pl.ds(row0, th + 2)]          # (TH+2, W+2, C)
    bias = b_ref[...]                              # (1, C) f32

    # 9 distinct shifted patches, extracted once, reused across parities.
    patches = [[slab[rs:rs + th, cs:cs + w, :].reshape(th * w, c)
                for cs in range(3)] for rs in range(3)]

    for a in range(2):
        ra = (a + 1) // 2
        for b in range(2):
            cb = (b + 1) // 2
            acc = None
            for dr in range(2):
                for dc in range(2):
                    d = jnp.dot(patches[ra + dr][cb + dc],
                                wf_ref[a, b, dr, dc],
                                preferred_element_type=jnp.float32)
                    acc = d if acc is None else acc + d
            o_ref[0, a, b] = (acc + bias).reshape(th, w, c).astype(o_ref.dtype)


def _upsample_kernel(x_ref, o_ref):
    """Nearest-2x upsample only (with_conv=False), NCHW, one (batch, row-tile).

    x_ref: (1, C, TH, W)
    o_ref: (1, 2, 2, C, TH, W)   o[0, a, b] == x  (parity-decomposed output)
    """
    x = x_ref[0]
    for a in range(2):
        for b in range(2):
            o_ref[0, a, b] = x


# -----------------------------------------------------------------------------
# Row-tile selection (conservative budget that also fits v7x's 64 MiB VMEM).
# -----------------------------------------------------------------------------
def _divisors_desc(n):
    return [d for d in range(n, 0, -1) if n % d == 0]


def _choose_conv_row_tile(H, W, C, in_bytes, budget=12 * 1024 * 1024):
    for th in _divisors_desc(H):
        vmem = ((H + 2) * (W + 2) * C * in_bytes * 2      # resident padded input (2 bufs)
                + 16 * C * C * in_bytes * 2 + 8 * C       # folded weights + bias
                + 4 * th * W * C * 4 * 2                  # f32 output block (2 bufs)
                + 9 * th * W * C * in_bytes               # hoisted patches
                + 6 * th * W * C * 4)                     # accumulators / temps
        if vmem <= budget:
            return th
    return 1


def _choose_plain_row_tile(H, W, C, x_bytes, budget=12 * 1024 * 1024):
    for th in _divisors_desc(H):
        if th != H and th % 8 != 0:      # keep the (8, 128) block constraint happy
            continue
        if C * th * W * x_bytes * 2 + 4 * C * th * W * x_bytes * 2 <= budget:
            return th
    return H


# -----------------------------------------------------------------------------
# Forward wrappers (jitted so pad / transposes fuse into single passes).
# -----------------------------------------------------------------------------
@partial(jax.jit, static_argnames=("row_tile", "compute_dtype"))
def upsample_conv_forward(x_nchw, w_oihw, bias, *, row_tile=None,
                          compute_dtype=jnp.bfloat16):
    N, C, H, W = x_nchw.shape
    th = (row_tile if row_tile is not None else
          _choose_conv_row_tile(H, W, C, jnp.dtype(compute_dtype).itemsize))
    assert H % th == 0, "row_tile must divide H"
    T = H // th

    x_nhwc = jnp.transpose(x_nchw, (0, 2, 3, 1))
    xpad = jnp.pad(x_nhwc, ((0, 0), (1, 1), (1, 1), (0, 0))).astype(compute_dtype)
    wf = _fold_weights(w_oihw, compute_dtype)
    b2d = bias.reshape(1, C).astype(jnp.float32)

    out6 = pl.pallas_call(
        _upsample_conv_kernel,
        out_shape=jax.ShapeDtypeStruct((N, 2, 2, H, W, C), jnp.float32),
        grid=(N, T),
        in_specs=[
            # padded input: resident across the row-tile axis (re-DMA per batch only)
            pl.BlockSpec((1, H + 2, W + 2, C), lambda n, t: (n, 0, 0, 0)),
            pl.BlockSpec((2, 2, 2, 2, C, C), lambda n, t: (0, 0, 0, 0, 0, 0)),
            pl.BlockSpec((1, C), lambda n, t: (0, 0)),
        ],
        out_specs=pl.BlockSpec((1, 2, 2, th, W, C), lambda n, t: (n, 0, 0, t, 0, 0)),
        compiler_params=pltpu.CompilerParams(
            dimension_semantics=("parallel", "parallel"),
            vmem_limit_bytes=32 * 1024 * 1024),
    )(xpad, wf, b2d)

    # Single fused pass: parity un-interleave + NHWC->NCHW.
    # (n, a, b, i, j, c) -> (n, c, i, a, j, b) -> (N, C, 2H, 2W)
    y = jnp.transpose(out6, (0, 5, 3, 1, 4, 2)).reshape(N, C, 2 * H, 2 * W)
    return y.astype(x_nchw.dtype)


@partial(jax.jit, static_argnames=("row_tile",))
def upsample_nearest_forward(x_nchw, *, row_tile=None):
    N, C, H, W = x_nchw.shape
    th = (row_tile if row_tile is not None else
          _choose_plain_row_tile(H, W, C, x_nchw.dtype.itemsize))
    assert H % th == 0 and (th == H or th % 8 == 0), "bad row_tile"
    T = H // th

    out6 = pl.pallas_call(
        _upsample_kernel,
        out_shape=jax.ShapeDtypeStruct((N, 2, 2, C, H, W), x_nchw.dtype),
        grid=(N, T),
        in_specs=[pl.BlockSpec((1, C, th, W), lambda n, t: (n, 0, t, 0))],
        out_specs=pl.BlockSpec((1, 2, 2, C, th, W), lambda n, t: (n, 0, 0, 0, t, 0)),
        compiler_params=pltpu.CompilerParams(
            dimension_semantics=("parallel", "parallel"),
            vmem_limit_bytes=32 * 1024 * 1024),
    )(x_nchw)

    # Single fused pass: (n, a, b, c, i, j) -> (n, c, i, a, j, b) -> (N, C, 2H, 2W)
    return jnp.transpose(out6, (0, 3, 4, 1, 5, 2)).reshape(N, C, 2 * H, 2 * W)


def upsample_forward(x_nchw, w_oihw=None, bias=None, *, with_conv=True,
                     row_tile=None, compute_dtype=jnp.bfloat16):
    """Equivalent of Upsample.forward. Input/output are NCHW."""
    if with_conv:
        return upsample_conv_forward(x_nchw, w_oihw, bias,
                                     row_tile=row_tile,
                                     compute_dtype=compute_dtype)
    return upsample_nearest_forward(x_nchw, row_tile=row_tile)


def init_upsample_params(key, in_channels):
    # Deterministic synthetic init matching torch.nn.Conv2d's default bounds.
    kw, kb = jax.random.split(key)
    fan_in = in_channels * 3 * 3
    bound = 1.0 / (fan_in ** 0.5)
    w_oihw = jax.random.uniform(kw, (in_channels, in_channels, 3, 3),
                                jnp.float32, -bound, bound)
    bias = jax.random.uniform(kb, (in_channels,), jnp.float32, -bound, bound)
    return w_oihw, bias


def _reference(x_nchw, w_oihw, bias, with_conv):
    """Pure-JAX (XLA) reference matching the PyTorch module."""
    up = jnp.repeat(jnp.repeat(x_nchw, 2, axis=2), 2, axis=3)
    if not with_conv:
        return up
    out = lax.conv_general_dilated(
        up, w_oihw, window_strides=(1, 1), padding=((1, 1), (1, 1)),
        dimension_numbers=("NCHW", "OIHW", "NCHW"),
        precision=lax.Precision.HIGHEST)
    return out + bias.reshape(1, -1, 1, 1)


if __name__ == "__main__":
    key = jax.random.PRNGKey(0)
    kx, kp = jax.random.split(key)
    N, C, H, W = 2, 4, 16, 16
    x = jax.random.normal(kx, (N, C, H, W), dtype=jnp.float32)
    w_oihw, bias = init_upsample_params(kp, C)

    # row_tile=8 exercises the row-tiled grid (grid=(2, 2)).
    y_f32 = jax.block_until_ready(
        upsample_forward(x, w_oihw, bias, with_conv=True,
                         row_tile=8, compute_dtype=jnp.float32))
    y_bf16 = jax.block_until_ready(
        upsample_forward(x, w_oihw, bias, with_conv=True,
                         row_tile=8, compute_dtype=jnp.bfloat16))
    y_plain = jax.block_until_ready(
        upsample_forward(x, with_conv=False, row_tile=8))

    ref_conv = _reference(x, w_oihw, bias, True)
    ref_plain = _reference(x, w_oihw, bias, False)

    assert y_f32.shape == (N, C, 2 * H, 2 * W)
    assert y_bf16.shape == (N, C, 2 * H, 2 * W)
    assert y_plain.shape == (N, C, 2 * H, 2 * W)
    assert jnp.allclose(y_plain, ref_plain), "nearest-upsample mismatch"
    assert jnp.allclose(y_f32, ref_conv, atol=1e-3, rtol=1e-3), "conv (f32) mismatch"
    assert jnp.allclose(y_bf16, ref_conv, atol=5e-2, rtol=5e-2), "conv (bf16) mismatch"

    print("KERNEL_OK")
</pallas_src>

<mosaic_0001>
module attributes {stable_mosaic.version = 11 : i64} {
  func.func @_upsample_conv_kernel(%arg0: i32, %arg1: i32, %arg2: memref<1x18x18x4xf32, #tpu.memory_space<vmem>>, %arg3: memref<2x2x2x2x4x4xf32, #tpu.memory_space<vmem>>, %arg4: memref<1x4xf32, #tpu.memory_space<vmem>>, %arg5: memref<1x2x2x8x16x4xf32, #tpu.memory_space<vmem>>) attributes {dimension_semantics = [#tpu.dimension_semantics<parallel>, #tpu.dimension_semantics<parallel>], iteration_bounds = array<i64: 2, 2>, scalar_prefetch = 0 : i64, scratch_operands = 0 : i64, tpu.core_type = #tpu.core_type<tc>, window_params = [{transform_indices = @transform_0, window_bounds = array<i64: 1, 18, 18, 4>}, {pipeline_mode = #tpu.pipeline_mode<synchronous>, transform_indices = @transform_1, window_bounds = array<i64: 2, 2, 2, 2, 4, 4>}, {pipeline_mode = #tpu.pipeline_mode<synchronous>, transform_indices = @transform_2, window_bounds = array<i64: 1, 4>}, {transform_indices = @transform_3, window_bounds = array<i64: 1, 2, 2, 8, 16, 4>}]} {
    %c8_i32 = arith.constant 8 : i32
    %0 = arith.muli %arg1, %c8_i32 : i32
    %1 = tpu.assume_multiple %0, 8 : i32
    %c0 = arith.constant 0 : index
    %2 = arith.index_cast %1 : i32 to index
    %c0_0 = arith.constant 0 : index
    %c0_1 = arith.constant 0 : index
    %3 = vector.load %arg2[%c0, %2, %c0_0, %c0_1] : memref<1x18x18x4xf32, #tpu.memory_space<vmem>>, vector<1x10x18x4xf32>
    %4 = vector.shape_cast %3 : vector<1x10x18x4xf32> to vector<10x18x4xf32>
    %c0_2 = arith.constant 0 : index
    %c0_3 = arith.constant 0 : index
    %5 = vector.load %arg4[%c0_2, %c0_3] : memref<1x4xf32, #tpu.memory_space<vmem>>, vector<1x4xf32>
    %6 = vector.extract_strided_slice %4 {offsets = [0, 0, 0], sizes = [8, 16, 4], strides = [1, 1, 1]} : vector<10x18x4xf32> to vector<8x16x4xf32>
    %7 = vector.shape_cast %6 : vector<8x16x4xf32> to vector<128x4xf32>
    %8 = vector.extract_strided_slice %4 {offsets = [0, 1, 0], sizes = [8, 16, 4], strides = [1, 1, 1]} : vector<10x18x4xf32> to vector<8x16x4xf32>
    %9 = vector.shape_cast %8 : vector<8x16x4xf32> to vector<128x4xf32>
    %10 = vector.extract_strided_slice %4 {offsets = [0, 2, 0], sizes = [8, 16, 4], strides = [1, 1, 1]} : vector<10x18x4xf32> to vector<8x16x4xf32>
    %11 = vector.shape_cast %10 : vector<8x16x4xf32> to vector<128x4xf32>
    %12 = vector.extract_strided_slice %4 {offsets = [1, 0, 0], sizes = [8, 16, 4], strides = [1, 1, 1]} : vector<10x18x4xf32> to vector<8x16x4xf32>
    %13 = vector.shape_cast %12 : vector<8x16x4xf32> to vector<128x4xf32>
    %14 = vector.extract_strided_slice %4 {offsets = [1, 1, 0], sizes = [8, 16, 4], strides = [1, 1, 1]} : vector<10x18x4xf32> to vector<8x16x4xf32>
    %15 = vector.shape_cast %14 : vector<8x16x4xf32> to vector<128x4xf32>
    %16 = vector.extract_strided_slice %4 {offsets = [1, 2, 0], sizes = [8, 16, 4], strides = [1, 1, 1]} : vector<10x18x4xf32> to vector<8x16x4xf32>
    %17 = vector.shape_cast %16 : vector<8x16x4xf32> to vector<128x4xf32>
    %18 = vector.extract_strided_slice %4 {offsets = [2, 0, 0], sizes = [8, 16, 4], strides = [1, 1, 1]} : vector<10x18x4xf32> to vector<8x16x4xf32>
    %19 = vector.shape_cast %18 : vector<8x16x4xf32> to vector<128x4xf32>
    %20 = vector.extract_strided_slice %4 {offsets = [2, 1, 0], sizes = [8, 16, 4], strides = [1, 1, 1]} : vector<10x18x4xf32> to vector<8x16x4xf32>
    %21 = vector.shape_cast %20 : vector<8x16x4xf32> to vector<128x4xf32>
    %22 = vector.extract_strided_slice %4 {offsets = [2, 2, 0], sizes = [8, 16, 4], strides = [1, 1, 1]} : vector<10x18x4xf32> to vector<8x16x4xf32>
    %23 = vector.shape_cast %22 : vector<8x16x4xf32> to vector<128x4xf32>
    %c0_4 = arith.constant 0 : index
    %c0_5 = arith.constant 0 : index
    %c0_6 = arith.constant 0 : index
    %c0_7 = arith.constant 0 : index
    %c0_8 = arith.constant 0 : index
    %c0_9 = arith.constant 0 : index
    %24 = vector.load %arg3[%c0_4, %c0_5, %c0_6, %c0_7, %c0_8, %c0_9] : memref<2x2x2x2x4x4xf32, #tpu.memory_space<vmem>>, vector<1x1x1x1x4x4xf32>
    %25 = vector.shape_cast %24 : vector<1x1x1x1x4x4xf32> to vector<4x4xf32>
    %cst = arith.constant dense<0.000000e+00> : vector<128x4xf32>
    %26 = tpu.matmul %7, %25, %cst {dimension_numbers = #tpu.dot_dimension_numbers<[1], [0], [0], [1], [0, 0, 1, 1], [], []>} : vector<128x4xf32>, vector<4x4xf32>, vector<128x4xf32> -> vector<128x4xf32>
    %c0_10 = arith.constant 0 : index
    %c0_11 = arith.constant 0 : index
    %c0_12 = arith.constant 0 : index
    %c1 = arith.constant 1 : index
    %c0_13 = arith.constant 0 : index
    %c0_14 = arith.constant 0 : index
    %27 = vector.load %arg3[%c0_10, %c0_11, %c0_12, %c1, %c0_13, %c0_14] : memref<2x2x2x2x4x4xf32, #tpu.memory_space<vmem>>, vector<1x1x1x1x4x4xf32>
    %28 = vector.shape_cast %27 : vector<1x1x1x1x4x4xf32> to vector<4x4xf32>
    %cst_15 = arith.constant dense<0.000000e+00> : vector<128x4xf32>
    %29 = tpu.matmul %9, %28, %cst_15 {dimension_numbers = #tpu.dot_dimension_numbers<[1], [0], [0], [1], [0, 0, 1, 1], [], []>} : vector<128x4xf32>, vector<4x4xf32>, vector<128x4xf32> -> vector<128x4xf32>
    %30 = arith.addf %26, %29 : vector<128x4xf32>
    %c0_16 = arith.constant 0 : index
    %c0_17 = arith.constant 0 : index
    %c1_18 = arith.constant 1 : index
    %c0_19 = arith.constant 0 : index
    %c0_20 = arith.constant 0 : index
    %c0_21 = arith.constant 0 : index
    %31 = vector.load %arg3[%c0_16, %c0_17, %c1_18, %c0_19, %c0_20, %c0_21] : memref<2x2x2x2x4x4xf32, #tpu.memory_space<vmem>>, vector<1x1x1x1x4x4xf32>
    %32 = vector.shape_cast %31 : vector<1x1x1x1x4x4xf32> to vector<4x4xf32>
    %cst_22 = arith.constant dense<0.000000e+00> : vector<128x4xf32>
    %33 = tpu.matmul %13, %32, %cst_22 {dimension_numbers = #tpu.dot_dimension_numbers<[1], [0], [0], [1], [0, 0, 1, 1], [], []>} : vector<128x4xf32>, vector<4x4xf32>, vector<128x4xf32> -> vector<128x4xf32>
    %34 = arith.addf %30, %33 : vector<128x4xf32>
    %c0_23 = arith.constant 0 : index
    %c0_24 = arith.constant 0 : index
    %c1_25 = arith.constant 1 : index
    %c1_26 = arith.constant 1 : index
    %c0_27 = arith.constant 0 : index
    %c0_28 = arith.constant 0 : index
    %35 = vector.load %arg3[%c0_23, %c0_24, %c1_25, %c1_26, %c0_27, %c0_28] : memref<2x2x2x2x4x4xf32, #tpu.memory_space<vmem>>, vector<1x1x1x1x4x4xf32>
    %36 = vector.shape_cast %35 : vector<1x1x1x1x4x4xf32> to vector<4x4xf32>
    %cst_29 = arith.constant dense<0.000000e+00> : vector<128x4xf32>
    %37 = tpu.matmul %15, %36, %cst_29 {dimension_numbers = #tpu.dot_dimension_numbers<[1], [0], [0], [1], [0, 0, 1, 1], [], []>} : vector<128x4xf32>, vector<4x4xf32>, vector<128x4xf32> -> vector<128x4xf32>
    %38 = arith.addf %34, %37 : vector<128x4xf32>
    %39 = vector.broadcast %5 : vector<1x4xf32> to vector<128x4xf32>
    %40 = arith.addf %38, %39 : vector<128x4xf32>
    %41 = vector.shape_cast %40 : vector<128x4xf32> to vector<8x16x4xf32>
    %c0_30 = arith.constant 0 : index
    %c0_31 = arith.constant 0 : index
    %c0_32 = arith.constant 0 : index
    %c0_33 = arith.constant 0 : index
    %c0_34 = arith.constant 0 : index
    %c0_35 = arith.constant 0 : index
    %42 = vector.load %arg5[%c0_30, %c0_31, %c0_32, %c0_33, %c0_34, %c0_35] : memref<1x2x2x8x16x4xf32, #tpu.memory_space<vmem>>, vector<1x1x1x8x16x4xf32>
    %43 = vector.shape_cast %42 : vector<1x1x1x8x16x4xf32> to vector<8x16x4xf32>
    %44 = vector.shape_cast %41 : vector<8x16x4xf32> to vector<1x1x1x8x16x4xf32>
    tpu.vector_store %arg5[%c0_30, %c0_31, %c0_32, %c0_33, %c0_34, %c0_35], %44 {strides = array<i32>} : memref<1x2x2x8x16x4xf32, #tpu.memory_space<vmem>>, vector<1x1x1x8x16x4xf32>,
    %c0_36 = arith.constant 0 : index
    %c1_37 = arith.constant 1 : index
    %c0_38 = arith.constant 0 : index
    %c0_39 = arith.constant 0 : index
    %c0_40 = arith.constant 0 : index
    %c0_41 = arith.constant 0 : index
    %45 = vector.load %arg3[%c0_36, %c1_37, %c0_38, %c0_39, %c0_40, %c0_41] : memref<2x2x2x2x4x4xf32, #tpu.memory_space<vmem>>, vector<1x1x1x1x4x4xf32>
    %46 = vector.shape_cast %45 : vector<1x1x1x1x4x4xf32> to vector<4x4xf32>
    %cst_42 = arith.constant dense<0.000000e+00> : vector<128x4xf32>
    %47 = tpu.matmul %9, %46, %cst_42 {dimension_numbers = #tpu.dot_dimension_numbers<[1], [0], [0], [1], [0, 0, 1, 1], [], []>} : vector<128x4xf32>, vector<4x4xf32>, vector<128x4xf32> -> vector<128x4xf32>
    %c0_43 = arith.constant 0 : index
    %c1_44 = arith.constant 1 : index
    %c0_45 = arith.constant 0 : index
    %c1_46 = arith.constant 1 : index
    %c0_47 = arith.constant 0 : index
    %c0_48 = arith.constant 0 : index
    %48 = vector.load %arg3[%c0_43, %c1_44, %c0_45, %c1_46, %c0_47, %c0_48] : memref<2x2x2x2x4x4xf32, #tpu.memory_space<vmem>>, vector<1x1x1x1x4x4xf32>
    %49 = vector.shape_cast %48 : vector<1x1x1x1x4x4xf32> to vector<4x4xf32>
    %cst_49 = arith.constant dense<0.000000e+00> : vector<128x4xf32>
    %50 = tpu.matmul %11, %49, %cst_49 {dimension_numbers = #tpu.dot_dimension_numbers<[1], [0], [0], [1], [0, 0, 1, 1], [], []>} : vector<128x4xf32>, vector<4x4xf32>, vector<128x4xf32> -> vector<128x4xf32>
    %51 = arith.addf %47, %50 : vector<128x4xf32>
    %c0_50 = arith.constant 0 : index
    %c1_51 = arith.constant 1 : index
    %c1_52 = arith.constant 1 : index
    %c0_53 = arith.constant 0 : index
    %c0_54 = arith.constant 0 : index
    %c0_55 = arith.constant 0 : index
    %52 = vector.load %arg3[%c0_50, %c1_51, %c1_52, %c0_53, %c0_54, %c0_55] : memref<2x2x2x2x4x4xf32, #tpu.memory_space<vmem>>, vector<1x1x1x1x4x4xf32>
    %53 = vector.shape_cast %52 : vector<1x1x1x1x4x4xf32> to vector<4x4xf32>
    %cst_56 = arith.constant dense<0.000000e+00> : vector<128x4xf32>
    %54 = tpu.matmul %15, %53, %cst_56 {dimension_numbers = #tpu.dot_dimension_numbers<[1], [0], [0], [1], [0, 0, 1, 1], [], []>} : vector<128x4xf32>, vector<4x4xf32>, vector<128x4xf32> -> vector<128x4xf32>
    %55 = arith.addf %51, %54 : vector<128x4xf32>
    %c0_57 = arith.constant 0 : index
    %c1_58 = arith.constant 1 : index
    %c1_59 = arith.constant 1 : index
    %c1_60 = arith.constant 1 : index
    %c0_61 = arith.constant 0 : index
    %c0_62 = arith.constant 0 : index
    %56 = vector.load %arg3[%c0_57, %c1_58, %c1_59, %c1_60, %c0_61, %c0_62] : memref<2x2x2x2x4x4xf32, #tpu.memory_space<vmem>>, vector<1x1x1x1x4x4xf32>
    %57 = vector.shape_cast %56 : vector<1x1x1x1x4x4xf32> to vector<4x4xf32>
    %cst_63 = arith.constant dense<0.000000e+00> : vector<128x4xf32>
    %58 = tpu.matmul %17, %57, %cst_63 {dimension_numbers = #tpu.dot_dimension_numbers<[1], [0], [0], [1], [0, 0, 1, 1], [], []>} : vector<128x4xf32>, vector<4x4xf32>, vector<128x4xf32> -> vector<128x4xf32>
    %59 = arith.addf %55, %58 : vector<128x4xf32>
    %60 = vector.broadcast %5 : vector<1x4xf32> to vector<128x4xf32>
    %61 = arith.addf %59, %60 : vector<128x4xf32>
    %62 = vector.shape_cast %61 : vector<128x4xf32> to vector<8x16x4xf32>
    %c0_64 = arith.constant 0 : index
    %c0_65 = arith.constant 0 : index
    %c1_66 = arith.constant 1 : index
    %c0_67 = arith.constant 0 : index
    %c0_68 = arith.constant 0 : index
    %c0_69 = arith.constant 0 : index
    %63 = vector.load %arg5[%c0_64, %c0_65, %c1_66, %c0_67, %c0_68, %c0_69] : memref<1x2x2x8x16x4xf32, #tpu.memory_space<vmem>>, vector<1x1x1x8x16x4xf32>
    %64 = vector.shape_cast %63 : vector<1x1x1x8x16x4xf32> to vector<8x16x4xf32>
    %65 = vector.shape_cast %62 : vector<8x16x4xf32> to vector<1x1x1x8x16x4xf32>
    tpu.vector_store %arg5[%c0_64, %c0_65, %c1_66, %c0_67, %c0_68, %c0_69], %65 {strides = array<i32>} : memref<1x2x2x8x16x4xf32, #tpu.memory_space<vmem>>, vector<1x1x1x8x16x4xf32>,
    %c1_70 = arith.constant 1 : index
    %c0_71 = arith.constant 0 : index
    %c0_72 = arith.constant 0 : index
    %c0_73 = arith.constant 0 : index
    %c0_74 = arith.constant 0 : index
    %c0_75 = arith.constant 0 : index
    %66 = vector.load %arg3[%c1_70, %c0_71, %c0_72, %c0_73, %c0_74, %c0_75] : memref<2x2x2x2x4x4xf32, #tpu.memory_space<vmem>>, vector<1x1x1x1x4x4xf32>
    %67 = vector.shape_cast %66 : vector<1x1x1x1x4x4xf32> to vector<4x4xf32>
    %cst_76 = arith.constant dense<0.000000e+00> : vector<128x4xf32>
    %68 = tpu.matmul %13, %67, %cst_76 {dimension_numbers = #tpu.dot_dimension_numbers<[1], [0], [0], [1], [0, 0, 1, 1], [], []>} : vector<128x4xf32>, vector<4x4xf32>, vector<128x4xf32> -> vector<128x4xf32>
    %c1_77 = arith.constant 1 : index
    %c0_78 = arith.constant 0 : index
    %c0_79 = arith.constant 0 : index
    %c1_80 = arith.constant 1 : index
    %c0_81 = arith.constant 0 : index
    %c0_82 = arith.constant 0 : index
    %69 = vector.load %arg3[%c1_77, %c0_78, %c0_79, %c1_80, %c0_81, %c0_82] : memref<2x2x2x2x4x4xf32, #tpu.memory_space<vmem>>, vector<1x1x1x1x4x4xf32>
    %70 = vector.shape_cast %69 : vector<1x1x1x1x4x4xf32> to vector<4x4xf32>
    %cst_83 = arith.constant dense<0.000000e+00> : vector<128x4xf32>
    %71 = tpu.matmul %15, %70, %cst_83 {dimension_numbers = #tpu.dot_dimension_numbers<[1], [0], [0], [1], [0, 0, 1, 1], [], []>} : vector<128x4xf32>, vector<4x4xf32>, vector<128x4xf32> -> vector<128x4xf32>
    %72 = arith.addf %68, %71 : vector<128x4xf32>
    %c1_84 = arith.constant 1 : index
    %c0_85 = arith.constant 0 : index
    %c1_86 = arith.constant 1 : index
    %c0_87 = arith.constant 0 : index
    %c0_88 = arith.constant 0 : index
    %c0_89 = arith.constant 0 : index
    %73 = vector.load %arg3[%c1_84, %c0_85, %c1_86, %c0_87, %c0_88, %c0_89] : memref<2x2x2x2x4x4xf32, #tpu.memory_space<vmem>>, vector<1x1x1x1x4x4xf32>
    %74 = vector.shape_cast %73 : vector<1x1x1x1x4x4xf32> to vector<4x4xf32>
    %cst_90 = arith.constant dense<0.000000e+00> : vector<128x4xf32>
    %75 = tpu.matmul %19, %74, %cst_90 {dimension_numbers = #tpu.dot_dimension_numbers<[1], [0], [0], [1], [0, 0, 1, 1], [], []>} : vector<128x4xf32>, vector<4x4xf32>, vector<128x4xf32> -> vector<128x4xf32>
    %76 = arith.addf %72, %75 : vector<128x4xf32>
    %c1_91 = arith.constant 1 : index
    %c0_92 = arith.constant 0 : index
    %c1_93 = arith.constant 1 : index
    %c1_94 = arith.constant 1 : index
    %c0_95 = arith.constant 0 : index
    %c0_96 = arith.constant 0 : index
    %77 = vector.load %arg3[%c1_91, %c0_92, %c1_93, %c1_94, %c0_95, %c0_96] : memref<2x2x2x2x4x4xf32, #tpu.memory_space<vmem>>, vector<1x1x1x1x4x4xf32>
    %78 = vector.shape_cast %77 : vector<1x1x1x1x4x4xf32> to vector<4x4xf32>
    %cst_97 = arith.constant dense<0.000000e+00> : vector<128x4xf32>
    %79 = tpu.matmul %21, %78, %cst_97 {dimension_numbers = #tpu.dot_dimension_numbers<[1], [0], [0], [1], [0, 0, 1, 1], [], []>} : vector<128x4xf32>, vector<4x4xf32>, vector<128x4xf32> -> vector<128x4xf32>
    %80 = arith.addf %76, %79 : vector<128x4xf32>
    %81 = vector.broadcast %5 : vector<1x4xf32> to vector<128x4xf32>
    %82 = arith.addf %80, %81 : vector<128x4xf32>
    %83 = vector.shape_cast %82 : vector<128x4xf32> to vector<8x16x4xf32>
    %c0_98 = arith.constant 0 : index
    %c1_99 = arith.constant 1 : index
    %c0_100 = arith.constant 0 : index
    %c0_101 = arith.constant 0 : index
    %c0_102 = arith.constant 0 : index
    %c0_103 = arith.constant 0 : index
    %84 = vector.load %arg5[%c0_98, %c1_99, %c0_100, %c0_101, %c0_102, %c0_103] : memref<1x2x2x8x16x4xf32, #tpu.memory_space<vmem>>, vector<1x1x1x8x16x4xf32>
    %85 = vector.shape_cast %84 : vector<1x1x1x8x16x4xf32> to vector<8x16x4xf32>
    %86 = vector.shape_cast %83 : vector<8x16x4xf32> to vector<1x1x1x8x16x4xf32>
    tpu.vector_store %arg5[%c0_98, %c1_99, %c0_100, %c0_101, %c0_102, %c0_103], %86 {strides = array<i32>} : memref<1x2x2x8x16x4xf32, #tpu.memory_space<vmem>>, vector<1x1x1x8x16x4xf32>,
    %c1_104 = arith.constant 1 : index
    %c1_105 = arith.constant 1 : index
    %c0_106 = arith.constant 0 : index
    %c0_107 = arith.constant 0 : index
    %c0_108 = arith.constant 0 : index
    %c0_109 = arith.constant 0 : index
    %87 = vector.load %arg3[%c1_104, %c1_105, %c0_106, %c0_107, %c0_108, %c0_109] : memref<2x2x2x2x4x4xf32, #tpu.memory_space<vmem>>, vector<1x1x1x1x4x4xf32>
    %88 = vector.shape_cast %87 : vector<1x1x1x1x4x4xf32> to vector<4x4xf32>
    %cst_110 = arith.constant dense<0.000000e+00> : vector<128x4xf32>
    %89 = tpu.matmul %15, %88, %cst_110 {dimension_numbers = #tpu.dot_dimension_numbers<[1], [0], [0], [1], [0, 0, 1, 1], [], []>} : vector<128x4xf32>, vector<4x4xf32>, vector<128x4xf32> -> vector<128x4xf32>
    %c1_111 = arith.constant 1 : index
    %c1_112 = arith.constant 1 : index
    %c0_113 = arith.constant 0 : index
    %c1_114 = arith.constant 1 : index
    %c0_115 = arith.constant 0 : index
    %c0_116 = arith.constant 0 : index
    %90 = vector.load %arg3[%c1_111, %c1_112, %c0_113, %c1_114, %c0_115, %c0_116] : memref<2x2x2x2x4x4xf32, #tpu.memory_space<vmem>>, vector<1x1x1x1x4x4xf32>
    %91 = vector.shape_cast %90 : vector<1x1x1x1x4x4xf32> to vector<4x4xf32>
    %cst_117 = arith.constant dense<0.000000e+00> : vector<128x4xf32>
    %92 = tpu.matmul %17, %91, %cst_117 {dimension_numbers = #tpu.dot_dimension_numbers<[1], [0], [0], [1], [0, 0, 1, 1], [], []>} : vector<128x4xf32>, vector<4x4xf32>, vector<128x4xf32> -> vector<128x4xf32>
    %93 = arith.addf %89, %92 : vector<128x4xf32>
    %c1_118 = arith.constant 1 : index
    %c1_119 = arith.constant 1 : index
    %c1_120 = arith.constant 1 : index
    %c0_121 = arith.constant 0 : index
    %c0_122 = arith.constant 0 : index
    %c0_123 = arith.constant 0 : index
    %94 = vector.load %arg3[%c1_118, %c1_119, %c1_120, %c0_121, %c0_122, %c0_123] : memref<2x2x2x2x4x4xf32, #tpu.memory_space<vmem>>, vector<1x1x1x1x4x4xf32>
    %95 = vector.shape_cast %94 : vector<1x1x1x1x4x4xf32> to vector<4x4xf32>
    %cst_124 = arith.constant dense<0.000000e+00> : vector<128x4xf32>
    %96 = tpu.matmul %21, %95, %cst_124 {dimension_numbers = #tpu.dot_dimension_numbers<[1], [0], [0], [1], [0, 0, 1, 1], [], []>} : vector<128x4xf32>, vector<4x4xf32>, vector<128x4xf32> -> vector<128x4xf32>
    %97 = arith.addf %93, %96 : vector<128x4xf32>
    %c1_125 = arith.constant 1 : index
    %c1_126 = arith.constant 1 : index
    %c1_127 = arith.constant 1 : index
    %c1_128 = arith.constant 1 : index
    %c0_129 = arith.constant 0 : index
    %c0_130 = arith.constant 0 : index
    %98 = vector.load %arg3[%c1_125, %c1_126, %c1_127, %c1_128, %c0_129, %c0_130] : memref<2x2x2x2x4x4xf32, #tpu.memory_space<vmem>>, vector<1x1x1x1x4x4xf32>
    %99 = vector.shape_cast %98 : vector<1x1x1x1x4x4xf32> to vector<4x4xf32>
    %cst_131 = arith.constant dense<0.000000e+00> : vector<128x4xf32>
    %100 = tpu.matmul %23, %99, %cst_131 {dimension_numbers = #tpu.dot_dimension_numbers<[1], [0], [0], [1], [0, 0, 1, 1], [], []>} : vector<128x4xf32>, vector<4x4xf32>, vector<128x4xf32> -> vector<128x4xf32>
    %101 = arith.addf %97, %100 : vector<128x4xf32>
    %102 = vector.broadcast %5 : vector<1x4xf32> to vector<128x4xf32>
    %103 = arith.addf %101, %102 : vector<128x4xf32>
    %104 = vector.shape_cast %103 : vector<128x4xf32> to vector<8x16x4xf32>
    %c0_132 = arith.constant 0 : index
    %c1_133 = arith.constant 1 : index
    %c1_134 = arith.constant 1 : index
    %c0_135 = arith.constant 0 : index
    %c0_136 = arith.constant 0 : index
    %c0_137 = arith.constant 0 : index
    %105 = vector.load %arg5[%c0_132, %c1_133, %c1_134, %c0_135, %c0_136, %c0_137] : memref<1x2x2x8x16x4xf32, #tpu.memory_space<vmem>>, vector<1x1x1x8x16x4xf32>
    %106 = vector.shape_cast %105 : vector<1x1x1x8x16x4xf32> to vector<8x16x4xf32>
    %107 = vector.shape_cast %104 : vector<8x16x4xf32> to vector<1x1x1x8x16x4xf32>
    tpu.vector_store %arg5[%c0_132, %c1_133, %c1_134, %c0_135, %c0_136, %c0_137], %107 {strides = array<i32>} : memref<1x2x2x8x16x4xf32, #tpu.memory_space<vmem>>, vector<1x1x1x8x16x4xf32>,
    return
  }
  func.func @transform_0(%arg0: i32, %arg1: i32) -> (i32, i32, i32, i32) {
    %c0_i32 = arith.constant 0 : i32
    %c0_i32_0 = arith.constant 0 : i32
    %c0_i32_1 = arith.constant 0 : i32
    %c0_i32_2 = arith.constant 0 : i32
    return %arg0, %c0_i32, %c0_i32_0, %c0_i32_1 : i32, i32, i32, i32
  }
  func.func @transform_1(%arg0: i32, %arg1: i32) -> (i32, i32, i32, i32, i32, i32) {
    %c0_i32 = arith.constant 0 : i32
    %c0_i32_0 = arith.constant 0 : i32
    %c0_i32_1 = arith.constant 0 : i32
    %c0_i32_2 = arith.constant 0 : i32
    %c0_i32_3 = arith.constant 0 : i32
    %c0_i32_4 = arith.constant 0 : i32
    %c0_i32_5 = arith.constant 0 : i32
    return %c0_i32, %c0_i32_0, %c0_i32_1, %c0_i32_2, %c0_i32_3, %c0_i32_4 : i32, i32, i32, i32, i32, i32
  }
  func.func @transform_2(%arg0: i32, %arg1: i32) -> (i32, i32) {
    %c0_i32 = arith.constant 0 : i32
    %c0_i32_0 = arith.constant 0 : i32
    %c0_i32_1 = arith.constant 0 : i32
    return %c0_i32, %c0_i32_0 : i32, i32
  }
  func.func @transform_3(%arg0: i32, %arg1: i32) -> (i32, i32, i32, i32, i32, i32) {
    %c0_i32 = arith.constant 0 : i32
    %c0_i32_0 = arith.constant 0 : i32
    %c0_i32_1 = arith.constant 0 : i32
    %c0_i32_2 = arith.constant 0 : i32
    %c0_i32_3 = arith.constant 0 : i32
    return %arg0, %c0_i32, %c0_i32_0, %arg1, %c0_i32_1, %c0_i32_2 : i32, i32, i32, i32, i32, i32
  }
}

</mosaic_0001>

<bundles_post_ra>
// kernel: upsample_conv_forward.1
= control target key start
LH: loop header
LB: loop body
LE: loop exit
PB: predicated region body
PF: predicated region fallthrough
CT: control target
= control target key end

     0   :  { %s4862_s12 = smov 0   ;;  %s4864_s13 = smov 0   ;;  %s6087_s0 = inlined_call_operand.vmem [shape: f32[2,18,18,4], index: 0, kind: input, shape index: {}]   ;;  %s6088_s1 = inlined_call_operand.vmem [shape: f32[2,2,2,2,4,4], index: 1, kind: input, shape index: {}]   ;;  %s6089_s2 = inlined_call_operand.vmem [shape: f32[1,4], index: 2, kind: input, shape index: {}]   ;;  %s6090_s3 = inlined_call_operand.vmem [shape: f32[2,2,2,16,16,4], index: 3, kind: output, shape index: {}]  }
   0x1   :  { %s4866_s14 = smov 0   ;;  %s4868_s15 = smov 0  }
   0x2   :  { %s4870_s16 = smov 0   ;;  %s4872_s17 = smov 0  }
   0x3   :  { %s4874_s18 = smov 0  }
   0x4 LB: > { %s22_s19 = sadd.s32 1, %s4832_s16  ;;  %s25_s20 = sadd.s32 1, %s4836_s17  ;;  %s4840_s18 = sphi %s4874_s18, %s13_s18   ;;  %s4836_s17 = sphi %s4872_s17, %s6097_s17   ;;  %s4832_s16 = sphi %s4870_s16, %s6096_s16   ;;  %s4828_s15 = sphi %s4868_s15, %s6095_s15   ;;  %s4824_s14 = sphi %s4866_s14, %s6094_s14   ;;  %s4820_s13 = sphi %s4864_s13, %s6093_s13   ;;  %s4816_s12 = sphi %s4862_s12, %s6092_s12  }
   0x5   : > { %p23_p0 = scmp.ge.s32.totalorder %s22_s19, 2  ;;  %s3496_s21 = sadd.s32 4294967295, %s4840_s18  }
   0x6   : > { %p112_p1 = scmp.ne.s32.totalorder %s4820_s13, %s4816_s12  ;;  %p113_p2 = scmp.eq.s32.totalorder %s3496_s21, 3 }
   0x7   : > { %s6099_s19 = smov (%p23_p0, %s22_s19), 0  ;;  %s6101_s20 = smov (!%p23_p0, %s25_s20), %s4836_s17 }
   0x8   : > { %s98_s22 = ssub.s32 %s4832_s16, %s6099_s19  ;;  %p27_p3 = scmp.ge.s32.totalorder %s6101_s20, 2 }
   0x9   : > { %p3500_p4 = scmp.ge.s32.totalorder %s4840_s18, 1  ;;  %p4908_p5 = por %p113_p2, %p112_p1 }
   0xa   : > { %p151_p6 = scmp.lt.s32.totalorder %s4840_s18, 5  ;;  %s6103_s20 = smov (%p27_p3, %s6101_s20), 0 }
   0xb   : > { %s97_s24 = ssub.s32 %s4836_s17, %s6103_s20  ;;  %s102_s26 = sadd.s32 1, %s4820_s13 }
   0xc   : > { %p152_p7 = pnand %p3500_p4, %p151_p6  ;;  %s99_s25 = sor.u32 %s98_s22, %s97_s24 }
   0xd   : > { %p100_p8 = scmp.eq.s32.totalorder %s99_s25, 0  ;;  %v3505_v0 = vld [vmem:[%s6088_s1 + $0x4] sm:$0xf] (!%p152_p7)  ;;  %vm382_vm0 = vcmask (!%p152_p7), 1043456   ;;  %v3578_v1 = vld [vmem:[%s6088_s1 + $0x14] sm:$0xf] (!%p152_p7) }
   0xe   : > { %155 = sbr.rel (%p152_p7) target bundleno = 518 (0x206), region = 32  ;;  %p174_p9 = scmp.lt.s32.totalorder (!%p152_p7), %s4828_s15, 1  ;;  %4121 = vmatprep.subr.msk.mxu0 (!%p152_p7), %vm382_vm0, %v3505_v0  ;;  %4225 = vmatprep.subr.msk.mxu1 (!%p152_p7), %vm382_vm0, %v3578_v1  ;;  %v346_v2 = vld [vmem:[%s6088_s1] sm:$0xf] (!%p152_p7)  ;;  %v3577_v3 = vld [vmem:[%s6088_s1 + $0x10] sm:$0xf] (!%p152_p7) }
   0xf   : > { %s4919_s27 = scalar_select %p100_p8, %s4820_s13, %s102_s26  }
  0x10   : > { %4122 = vmatpush3.msk.msra.mxu0 (!%p152_p7), %vm382_vm0, %v3505_v0  ;;  %4226 = vmatpush3.msk.msra.mxu1 (!%p152_p7), %vm382_vm0, %v3578_v1  ;;  %s3504_s10 = smul.u32 (!%p152_p7), 192, %s4824_s14  ;;  %vm238_vm1 = vcmask (!%p152_p7), 1046528   ;;  %vm349_vm2 = vcmask (!%p152_p7), 31744   ;;  %vm279_vm3 = vcmask (!%p152_p7), 1045504   ;;  %v4996_v30 = vld [vmem:[%s6088_s1 + $0x8] sm:$0xf] (!%p152_p7) }
  0x11   : > { %4147 = vmatprep.subr.msk.mxu0 (!%p152_p7), %vm382_vm0, %v346_v2  ;;  %4251 = vmatprep.subr.msk.mxu1 (!%p152_p7), %vm382_vm0, %v3577_v3  ;;  %v5012_v36 = vld [vmem:[%s6088_s1 + $0x18] sm:$0xf] (!%p152_p7) }
  0x15   : > { %s175_s7 = scalar_select %p174_p9, %s4828_s15, 1 }
  0x16   : > { %s3844_s22 = sshll.u32 (%p4908_p5), %s4828_s15, 7 }
  0x17   : > { %s4729_s11 = smul.u32 432, %s175_s7 }
  0x19   : > { %s178_s24 = scalar_lea.vmem %s6087_s0, %s4729_s11 }
  0x1a   : > { %s4945_s25 = scalar_lea.vmem %s178_s24, %s3504_s10 }
  0x1b   : > { %v4948_v4 = vld [vmem:[%s4945_s25] sm:$0xff]  ;;  %v4951_v5 = vld [vmem:[%s4945_s25 + $0x8] sm:$0xff]  ;;  %v185_v6 = vld [vmem:[%s4945_s25 + $0x10] sm:$0x3] }
  0x1c   : > { %v239_v7 = vrot.slane %v4948_v4, 1  ;;  %v240_v8 = vrot.slane %v4951_v5, 1  ;;  %v280_v9 = vrot.slane %v4948_v4, 2  ;;  %v281_v10 = vrot.slane %v4951_v5, 2  ;;  %v4959_v11 = vld [vmem:[%s4945_s25 + $0x18] sm:$0xff]  ;;  %v4962_v12 = vld [vmem:[%s4945_s25 + $0x20] sm:$0xff] }
  0x1d   : > { %v242_v13 = vrot.slane %v185_v6, 1  ;;  %v283_v14 = vrot.slane %v185_v6, 2  ;;  %v244_v15 = vrot.slane %v4959_v11, 1  ;;  %v245_v16 = vrot.slane %v4962_v12, 1  ;;  %v188_v17 = vld [vmem:[%s4945_s25 + $0x28] sm:$0x3] }
  0x1e   : > { %v4968_v18 = vsel %vm238_vm1, %v239_v7, %v240_v8  ;;  %v282_v19 = vsel %vm279_vm3, %v280_v9, %v281_v10  ;;  %v285_v20 = vrot.slane %v4959_v11, 2  ;;  %v286_v21 = vrot.slane %v4962_v12, 2  ;;  %v4974_v22 = vld [vmem:[%s4945_s25 + $0x30] sm:$0xff]  ;;  %v4977_v23 = vld [vmem:[%s4945_s25 + $0x38] sm:$0xff]  ;;  %v191_v24 = vld [vmem:[%s4945_s25 + $0x40] sm:$0x3] }
  0x1f   : > { %4123 = vmatprep.mubr.msk.f32.mxu0 %vm349_vm2, %v4968_v18  ;;  %4227 = vmatprep.mubr.msk.f32.mxu1 %vm349_vm2, %v282_v19  ;;  %v4984_v25 = vsel %vm238_vm1, %v240_v8, %v242_v13  ;;  %v284_v26 = vsel %vm279_vm3, %v281_v10, %v283_v14  ;;  %v4988_v27 = vsel %vm238_vm1, %v244_v15, %v245_v16  ;;  %v247_v28 = vrot.slane %v188_v17, 1  ;;  %v4991_v29 = vld [vmem:[%s4945_s25 + $0x48] sm:$0xff]  ;;  %v5007_v35 = vld [vmem:[%s4945_s25 + $0x50] sm:$0xff]  ;;  %v194_v41 = vld [vmem:[%s4945_s25 + $0x58] sm:$0x3] }
  0x20   : > { %4124 = vmatmul.mubr.msk.f32.vlgmr.msra.gmra.mrb[0].mxu0 %vm349_vm2, %v4984_v25  ;;  %4228 = vmatmul.mubr.msk.f32.vlgmr.msra.gmra.mrb[0].mxu1 %vm349_vm2, %v284_v26  ;;  %v5002_v31 = vsel %vm279_vm3, %v285_v20, %v286_v21  ;;  %v288_v32 = vrot.slane %v188_v17, 2  ;;  %v249_v33 = vrot.slane %v4974_v22, 1  ;;  %v250_v34 = vrot.slane %v4977_v23, 1  ;;  %v5034_v46 = vld [vmem:[%s4945_s25 + $0x60] sm:$0xff]  ;;  %v5037_v47 = vld [vmem:[%s4945_s25 + $0x68] sm:$0xff]  ;;  %v5075_v63 = vld [vmem:[%s4945_s25 + $0x78] sm:$0xff] }
  0x21   : > { %4148 = vmatpush3.msk.msra.mxu0 %vm382_vm0, %v346_v2  ;;  %4252 = vmatpush3.msk.msra.mxu1 %vm382_vm0, %v3577_v3  ;;  %v5017_v37 = vsel %vm238_vm1, %v245_v16, %v247_v28  ;;  %v290_v38 = vrot.slane %v4974_v22, 2  ;;  %v291_v39 = vrot.slane %v4977_v23, 2  ;;  %v252_v40 = vrot.slane %v191_v24, 1  ;;  %v197_v62 = vld [vmem:[%s4945_s25 + $0x70] sm:$0x3]  ;;  %v5078_v0 = vld [vmem:[%s4945_s25 + $0x80] sm:$0xff] }
  0x22   : > { %4126 = vmatprep.mubr.msk.f32.mxu0 %vm349_vm2, %v4988_v27  ;;  %4230 = vmatprep.mubr.msk.f32.mxu1 %vm349_vm2, %v5002_v31  ;;  %v5027_v42 = vsel %vm279_vm3, %v286_v21, %v288_v32  ;;  %v5030_v43 = vsel %vm238_vm1, %v249_v33, %v250_v34  ;;  %v293_v44 = vrot.slane %v191_v24, 2  ;;  %v254_v45 = vrot.slane %v4991_v29, 1  ;;  %v200_v9 = vld [vmem:[%s4945_s25 + $0x88] sm:$0x3]  ;;  %v5106_v16 = vld [vmem:[%s4945_s25 + $0x90] sm:$0xff]  ;;  %v5109_v17 = vld [vmem:[%s4945_s25 + $0x98] sm:$0xff] }
  0x23   : > { %v5040_v48 = vsel %vm279_vm3, %v290_v38, %v291_v39  ;;  %v255_v49 = vrot.slane %v5007_v35, 1  ;;  %v295_v50 = vrot.slane %v4991_v29, 2  ;;  %4173 = vmatprep.subr.msk.mxu0 %vm382_vm0, %v4996_v30  ;;  %4277 = vmatprep.subr.msk.mxu1 %vm382_vm0, %v5012_v36  ;;  %v296_v51 = vrot.slane %v5007_v35, 2 }
  0x24   : > { %4127 = vmatmul.mubr.msk.f32.gmra.mrb[2].mxu0 %vm349_vm2, %v5017_v37  ;;  %4231 = vmatmul.mubr.msk.f32.gmra.mrb[2].mxu1 %vm349_vm2, %v5027_v42  ;;  %v257_v52 = vrot.slane %v194_v41, 1  ;;  %v298_v53 = vrot.slane %v194_v41, 2  ;;  %v5058_v54 = vsel %vm238_vm1, %v250_v34, %v252_v40  ;;  %v5061_v55 = vsel %vm279_vm3, %v291_v39, %v293_v44  ;;  %v203_v39 = vld [vmem:[%s4945_s25 + $0xa0] sm:$0x3]  ;;  %v5137_v40 = vld [vmem:[%s4945_s25 + $0xa8] sm:$0xff]  ;;  %v5140_v41 = vld [vmem:[%s4945_s25 + $0xb0] sm:$0xff] }
  0x25   : > { %4129 = vmatprep.mubr.msk.f32.mxu0 %vm349_vm2, %v5030_v43  ;;  %4233 = vmatprep.mubr.msk.f32.mxu1 %vm349_vm2, %v5040_v48  ;;  %v259_v56 = vrot.slane %v5034_v46, 1  ;;  %v260_v57 = vrot.slane %v5037_v47, 1  ;;  %v5066_v58 = vsel %vm238_vm1, %v254_v45, %v255_v49  ;;  %v5069_v59 = vsel %vm279_vm3, %v295_v50, %v296_v51 }
  0x26   : > { %v300_v60 = vrot.slane %v5034_v46, 2  ;;  %v301_v61 = vrot.slane %v5037_v47, 2  ;;  %v5085_v1 = vsel %vm238_vm1, %v255_v49, %v257_v52  ;;  %v5088_v2 = vsel %vm279_vm3, %v296_v51, %v298_v53 }
  0x27   : > { %v5095_v3 = vsel %vm238_vm1, %v259_v56, %v260_v57  ;;  %v262_v6 = vrot.slane %v197_v62, 1  ;;  %v303_v7 = vrot.slane %v197_v62, 2  ;;  %v264_v8 = vrot.slane %v5075_v63, 1 }
  0x28   : > { %4130 = vmatmul.mubr.msk.f32.gmra.mrb[4].mxu0 %vm349_vm2, %v5058_v54  ;;  %4234 = vmatmul.mubr.msk.f32.gmra.mrb[4].mxu1 %vm349_vm2, %v5061_v55  ;;  %v5100_v10 = vsel %vm279_vm3, %v300_v60, %v301_v61  ;;  %v265_v13 = vrot.slane %v5078_v0, 1  ;;  %v305_v14 = vrot.slane %v5075_v63, 2  ;;  %v306_v15 = vrot.slane %v5078_v0, 2 }
  0x29   : > { %4132 = vmatprep.mubr.msk.f32.mxu0 %vm349_vm2, %v5066_v58  ;;  %4236 = vmatprep.mubr.msk.f32.mxu1 %vm349_vm2, %v5069_v59  ;;  %v267_v19 = vrot.slane %v200_v9, 1  ;;  %v308_v20 = vrot.slane %v200_v9, 2  ;;  %v5120_v21 = vsel %vm238_vm1, %v260_v57, %v262_v6  ;;  %v5123_v24 = vsel %vm279_vm3, %v301_v61, %v303_v7  ;;  %v206_v61 = vld [vmem:[%s4945_s25 + $0xb8] sm:$0x3] }
  0x2a   : > { %v269_v26 = vrot.slane %v5106_v16, 1  ;;  %v270_v28 = vrot.slane %v5109_v17, 1  ;;  %v5128_v32 = vsel %vm238_vm1, %v264_v8, %v265_v13  ;;  %v5131_v33 = vsel %vm279_vm3, %v305_v14, %v306_v15 }
  0x2b   : > { %v310_v34 = vrot.slane %v5106_v16, 2  ;;  %v311_v38 = vrot.slane %v5109_v17, 2  ;;  %v5147_v44 = vsel %vm238_vm1, %v265_v13, %v267_v19  ;;  %v5150_v45 = vsel %vm279_vm3, %v306_v15, %v308_v20  ;;  %v3558_v19 = vld [vmem:[%s6088_s1 + $0xc] sm:$0xf]  ;;  %v3631_v20 = vld [vmem:[%s6088_s1 + $0x1c] sm:$0xf] }
  0x2c   : > { %4133 = vmatmul.mubr.msk.f32.gmra.mrb[6].mxu0 %vm349_vm2, %v5085_v1  ;;  %4237 = vmatmul.mubr.msk.f32.gmra.mrb[6].mxu1 %vm349_vm2, %v5088_v2  ;;  %v5157_v49 = vsel %vm238_vm1, %v269_v26, %v270_v28  ;;  %v272_v50 = vrot.slane %v203_v39, 1  ;;  %v313_v51 = vrot.slane %v203_v39, 2  ;;  %v274_v52 = vrot.slane %v5137_v40, 1  ;;  %v209_v26 = vld [vmem:[%s4945_s25 + $0xd0] sm:$0x3] }
  0x2d   : > { %4135 = vmatprep.mubr.msk.f32.mxu0 %vm349_vm2, %v5095_v3  ;;  %4239 = vmatprep.mubr.msk.f32.mxu1 %vm349_vm2, %v5100_v10  ;;  %v5161_v53 = vsel %vm279_vm3, %v310_v34, %v311_v38  ;;  %v275_v56 = vrot.slane %v5140_v41, 1  ;;  %v315_v57 = vrot.slane %v5137_v40, 2  ;;  %v316_v60 = vrot.slane %v5140_v41, 2  ;;  %v3665_v39 = vld [vmem:[%s6088_s1 + $0x20] sm:$0xf] }
  0x2e   : > { %v5176_v62 = vsel %vm238_vm1, %v270_v28, %v272_v50  ;;  %v5179_v6 = vsel %vm279_vm3, %v311_v38, %v313_v51  ;;  %v277_v7 = vrot.slane %v206_v61, 1  ;;  %v318_v8 = vrot.slane %v206_v61, 2  ;;  %v3753_v50 = vld [vmem:[%s6088_s1 + $0x30] sm:$0xf]  ;;  %v3701_v61 = vld [vmem:[%s6088_s1 + $0x28] sm:$0xf] }
  0x2f   : > { %v5182_v9 = vsel %vm238_vm1, %v274_v52, %v275_v56  ;;  %v5185_v13 = vsel %vm279_vm3, %v315_v57, %v316_v60  ;;  %v326_v28 = vrot.slane %v209_v26, 1 }
  0x30   : > { %4136 = vmatmul.mubr.msk.f32.gmra.mrb[8].mxu0 %vm349_vm2, %v5120_v21  ;;  %4240 = vmatmul.mubr.msk.f32.gmra.mrb[8].mxu1 %vm349_vm2, %v5123_v24  ;;  %v5196_v14 = vsel %vm238_vm1, %v275_v56, %v277_v7  ;;  %v5199_v15 = vsel %vm279_vm3, %v316_v60, %v318_v8  ;;  %v331_v56 = vrot.slane %v209_v26, 2  ;;  %v3789_v7 = vld [vmem:[%s6088_s1 + $0x38] sm:$0xf] }
  0x31   : > { %4138 = vmatprep.mubr.msk.f32.mxu0 %vm349_vm2, %v5128_v32  ;;  %4242 = vmatprep.mubr.msk.f32.mxu1 %vm349_vm2, %v5131_v33 }
  0x34   : > { %4139 = vmatmul.mubr.msk.f32.gmra.mrb[10].mxu0 %vm349_vm2, %v5147_v44  ;;  %4243 = vmatmul.mubr.msk.f32.gmra.mrb[10].mxu1 %vm349_vm2, %v5150_v45 }
  0x35   : > { %4141 = vmatprep.mubr.msk.f32.mxu0 %vm349_vm2, %v5157_v49  ;;  %4245 = vmatprep.mubr.msk.f32.mxu1 %vm349_vm2, %v5161_v53 }
  0x38   : > { %4142 = vmatmul.mubr.msk.f32.gmra.mrb[12].mxu0 %vm349_vm2, %v5176_v62  ;;  %4246 = vmatmul.mubr.msk.f32.gmra.mrb[12].mxu1 %vm349_vm2, %v5179_v6 }
  0x39   : > { %4144 = vmatprep.mubr.msk.f32.mxu0 %vm349_vm2, %v5182_v9  ;;  %4248 = vmatprep.mubr.msk.f32.mxu1 %vm349_vm2, %v5185_v13 }
  0x3c   : > { %4145 = vmatmul.mubr.msk.f32.gmra.mrb[14].mxu0 %vm349_vm2, %v5196_v14  ;;  %4249 = vmatmul.mubr.msk.f32.gmra.mrb[14].mxu1 %vm349_vm2, %v5199_v15 }
  0x3d   : > { %4149 = vmatprep.mubr.msk.f32.mxu0 %vm349_vm2, %v4948_v4  ;;  %4253 = vmatprep.mubr.msk.f32.mxu1 %vm349_vm2, %v4968_v18  ;;  %v3666_v4 = vld [vmem:[%s6088_s1 + $0x24] sm:$0xf] }
  0x3e   : > { %v5328_v18 = vld [vmem:[%s4945_s25 + $0xc0] sm:$0xff] }
  0x3f   : > { %v328_v51 = vrot.slane %v5328_v18, 2 }
  0x40   : > { %4150 = vmatmul.mubr.msk.f32.vlgmr.msra.gmra.mrb[0].mxu0 %vm349_vm2, %v4951_v5  ;;  %4254 = vmatmul.mubr.msk.f32.vlgmr.msra.gmra.mrb[0].mxu1 %vm349_vm2, %v4984_v25  ;;  %v3754_v5 = vld [vmem:[%s6088_s1 + $0x34] sm:$0xf]  ;;  %v5331_v25 = vld [vmem:[%s4945_s25 + $0xc8] sm:$0xff] }
  0x41   : > { %4174 = vmatpush3.msk.msra.mxu0 %vm382_vm0, %v4996_v30  ;;  %4278 = vmatpush3.msk.msra.mxu1 %vm382_vm0, %v5012_v36  ;;  %v323_v30 = vrot.slane %v5328_v18, 1  ;;  %v324_v36 = vrot.slane %v5331_v25, 1  ;;  %v329_v52 = vrot.slane %v5331_v25, 2 }
  0x42   : > { %4152 = vmatprep.mubr.msk.f32.mxu0 %vm349_vm2, %v4959_v11  ;;  %4256 = vmatprep.mubr.msk.f32.mxu1 %vm349_vm2, %v4988_v27 }
  0x43   : > { %4199 = vmatprep.subr.msk.mxu0 %vm382_vm0, %v3558_v19  ;;  %4303 = vmatprep.subr.msk.mxu1 %vm382_vm0, %v3631_v20  ;;  %v5353_v34 = vsel %vm238_vm1, %v323_v30, %v324_v36  ;;  %v5364_v38 = vsel %vm238_vm1, %v324_v36, %v326_v28  ;;  %v5435_v57 = vsel %vm279_vm3, %v328_v51, %v329_v52 }
  0x44   : > { %4153 = vmatmul.mubr.msk.f32.gmra.mrb[2].mxu0 %vm349_vm2, %v4962_v12  ;;  %4257 = vmatmul.mubr.msk.f32.gmra.mrb[2].mxu1 %vm349_vm2, %v5017_v37  ;;  %v5446_v60 = vsel %vm279_vm3, %v329_v52, %v331_v56 }
  0x45   : > { %4155 = vmatprep.mubr.msk.f32.mxu0 %vm349_vm2, %v4974_v22  ;;  %4259 = vmatprep.mubr.msk.f32.mxu1 %vm349_vm2, %v5030_v43 }
  0x48   : > { %4156 = vmatmul.mubr.msk.f32.gmra.mrb[4].mxu0 %vm349_vm2, %v4977_v23  ;;  %4260 = vmatmul.mubr.msk.f32.gmra.mrb[4].mxu1 %vm349_vm2, %v5058_v54 }
  0x49   : > { %4158 = vmatprep.mubr.msk.f32.mxu0 %vm349_vm2, %v4991_v29  ;;  %4262 = vmatprep.mubr.msk.f32.mxu1 %vm349_vm2, %v5066_v58 }
  0x4c   : > { %4159 = vmatmul.mubr.msk.f32.gmra.mrb[6].mxu0 %vm349_vm2, %v5007_v35  ;;  %4263 = vmatmul.mubr.msk.f32.gmra.mrb[6].mxu1 %vm349_vm2, %v5085_v1 }
  0x4d   : > { %4161 = vmatprep.mubr.msk.f32.mxu0 %vm349_vm2, %v5034_v46  ;;  %4265 = vmatprep.mubr.msk.f32.mxu1 %vm349_vm2, %v5095_v3 }
  0x50   : > { %4162 = vmatmul.mubr.msk.f32.gmra.mrb[8].mxu0 %vm349_vm2, %v5037_v47  ;;  %4266 = vmatmul.mubr.msk.f32.gmra.mrb[8].mxu1 %vm349_vm2, %v5120_v21 }
  0x51   : > { %4164 = vmatprep.mubr.msk.f32.mxu0 %vm349_vm2, %v5075_v63  ;;  %4268 = vmatprep.mubr.msk.f32.mxu1 %vm349_vm2, %v5128_v32 }
  0x54   : > { %4165 = vmatmul.mubr.msk.f32.gmra.mrb[10].mxu0 %vm349_vm2, %v5078_v0  ;;  %4269 = vmatmul.mubr.msk.f32.gmra.mrb[10].mxu1 %vm349_vm2, %v5147_v44 }
  0x55   : > { %4167 = vmatprep.mubr.msk.f32.mxu0 %vm349_vm2, %v5106_v16  ;;  %4271 = vmatprep.mubr.msk.f32.mxu1 %vm349_vm2, %v5157_v49 }
  0x58   : > { %4168 = vmatmul.mubr.msk.f32.gmra.mrb[12].mxu0 %vm349_vm2, %v5109_v17  ;;  %4272 = vmatmul.mubr.msk.f32.gmra.mrb[12].mxu1 %vm349_vm2, %v5176_v62 }
  0x59   : > { %4170 = vmatprep.mubr.msk.f32.mxu0 %vm349_vm2, %v5137_v40  ;;  %4274 = vmatprep.mubr.msk.f32.mxu1 %vm349_vm2, %v5182_v9 }
  0x5c   : > { %4171 = vmatmul.mubr.msk.f32.gmra.mrb[14].mxu0 %vm349_vm2, %v5140_v41  ;;  %4275 = vmatmul.mubr.msk.f32.gmra.mrb[14].mxu1 %vm349_vm2, %v5196_v14 }
  0x5d   : > { %4175 = vmatprep.mubr.msk.f32.mxu0 %vm349_vm2, %v4959_v11  ;;  %4279 = vmatprep.mubr.msk.f32.mxu1 %vm349_vm2, %v4988_v27 }
  0x60   : > { %4176 = vmatmul.mubr.msk.f32.vlgmr.msra.gmra.mrb[0].mxu0 %vm349_vm2, %v4962_v12  ;;  %4280 = vmatmul.mubr.msk.f32.vlgmr.msra.gmra.mrb[0].mxu1 %vm349_vm2, %v5017_v37 }
  0x61   : > { %4200 = vmatpush3.msk.msra.mxu0 %vm382_vm0, %v3558_v19  ;;  %4304 = vmatpush3.msk.msra.mxu1 %vm382_vm0, %v3631_v20 }
  0x62   : > { %4178 = vmatprep.mubr.msk.f32.mxu0 %vm349_vm2, %v4974_v22  ;;  %4282 = vmatprep.mubr.msk.f32.mxu1 %vm349_vm2, %v5030_v43 }
  0x63   : > { %4329 = vmatprep.subr.msk.mxu0 %vm382_vm0, %v3666_v4  ;;  %4433 = vmatprep.subr.msk.mxu1 %vm382_vm0, %v3754_v5 }
  0x64   : > { %4179 = vmatmul.mubr.msk.f32.gmra.mrb[2].mxu0 %vm349_vm2, %v4977_v23  ;;  %4283 = vmatmul.mubr.msk.f32.gmra.mrb[2].mxu1 %vm349_vm2, %v5058_v54 }
  0x65   : > { %4181 = vmatprep.mubr.msk.f32.mxu0 %vm349_vm2, %v4991_v29  ;;  %4285 = vmatprep.mubr.msk.f32.mxu1 %vm349_vm2, %v5066_v58 }
  0x68   : > { %4182 = vmatmul.mubr.msk.f32.gmra.mrb[4].mxu0 %vm349_vm2, %v5007_v35  ;;  %4286 = vmatmul.mubr.msk.f32.gmra.mrb[4].mxu1 %vm349_vm2, %v5085_v1 }
  0x69   : > { %4184 = vmatprep.mubr.msk.f32.mxu0 %vm349_vm2, %v5034_v46  ;;  %4288 = vmatprep.mubr.msk.f32.mxu1 %vm349_vm2, %v5095_v3 }
  0x6c   : > { %4185 = vmatmul.mubr.msk.f32.gmra.mrb[6].mxu0 %vm349_vm2, %v5037_v47  ;;  %4289 = vmatmul.mubr.msk.f32.gmra.mrb[6].mxu1 %vm349_vm2, %v5120_v21 }
  0x6d   : > { %4187 = vmatprep.mubr.msk.f32.mxu0 %vm349_vm2, %v5075_v63  ;;  %4291 = vmatprep.mubr.msk.f32.mxu1 %vm349_vm2, %v5128_v32 }
  0x70   : > { %4188 = vmatmul.mubr.msk.f32.gmra.mrb[8].mxu0 %vm349_vm2, %v5078_v0  ;;  %4292 = vmatmul.mubr.msk.f32.gmra.mrb[8].mxu1 %vm349_vm2, %v5147_v44 }
  0x71   : > { %4190 = vmatprep.mubr.msk.f32.mxu0 %vm349_vm2, %v5106_v16  ;;  %4294 = vmatprep.mubr.msk.f32.mxu1 %vm349_vm2, %v5157_v49 }
  0x74   : > { %4191 = vmatmul.mubr.msk.f32.gmra.mrb[10].mxu0 %vm349_vm2, %v5109_v17  ;;  %4295 = vmatmul.mubr.msk.f32.gmra.mrb[10].mxu1 %vm349_vm2, %v5176_v62 }
  0x75   : > { %4193 = vmatprep.mubr.msk.f32.mxu0 %vm349_vm2, %v5137_v40  ;;  %4297 = vmatprep.mubr.msk.f32.mxu1 %vm349_vm2, %v5182_v9 }
  0x78   : > { %4194 = vmatmul.mubr.msk.f32.gmra.mrb[12].mxu0 %vm349_vm2, %v5140_v41  ;;  %4298 = vmatmul.mubr.msk.f32.gmra.mrb[12].mxu1 %vm349_vm2, %v5196_v14 }
  0x79   : > { %4196 = vmatprep.mubr.msk.f32.mxu0 %vm349_vm2, %v5328_v18  ;;  %4300 = vmatprep.mubr.msk.f32.mxu1 %vm349_vm2, %v5353_v34 }
  0x7c   : > { %4197 = vmatmul.mubr.msk.f32.gmra.mrb[14].mxu0 %vm349_vm2, %v5331_v25  ;;  %4301 = vmatmul.mubr.msk.f32.gmra.mrb[14].mxu1 %vm349_vm2, %v5364_v38 }
  0x7d   : > { %4201 = vmatprep.mubr.msk.f32.mxu0 %vm349_vm2, %v4988_v27  ;;  %4305 = vmatprep.mubr.msk.f32.mxu1 %vm349_vm2, %v5002_v31 }
  0x80   : > { %4202 = vmatmul.mubr.msk.f32.vlgmr.msra.gmra.mrb[0].mxu0 %vm349_vm2, %v5017_v37  ;;  %4306 = vmatmul.mubr.msk.f32.vlgmr.msra.gmra.mrb[0].mxu1 %vm349_vm2, %v5027_v42 }
  0x81   : > { %4330 = vmatpush3.msk.msra.mxu0 %vm382_vm0, %v3666_v4  ;;  %4434 = vmatpush3.msk.msra.mxu1 %vm382_vm0, %v3754_v5 }
  0x82   : > { %4204 = vmatprep.mubr.msk.f32.mxu0 %vm349_vm2, %v5030_v43  ;;  %4308 = vmatprep.mubr.msk.f32.mxu1 %vm349_vm2, %v5040_v48 }
  0x83   : > { %4355 = vmatprep.subr.msk.mxu0 %vm382_vm0, %v3665_v39  ;;  %4459 = vmatprep.subr.msk.mxu1 %vm382_vm0, %v3753_v50 }
  0x84   : > { %4205 = vmatmul.mubr.msk.f32.gmra.mrb[2].mxu0 %vm349_vm2, %v5058_v54  ;;  %4309 = vmatmul.mubr.msk.f32.gmra.mrb[2].mxu1 %vm349_vm2, %v5061_v55 }
  0x85   : > { %4207 = vmatprep.mubr.msk.f32.mxu0 %vm349_vm2, %v5066_v58  ;;  %4311 = vmatprep.mubr.msk.f32.mxu1 %vm349_vm2, %v5069_v59 }
  0x88   : > { %4208 = vmatmul.mubr.msk.f32.gmra.mrb[4].mxu0 %vm349_vm2, %v5085_v1  ;;  %4312 = vmatmul.mubr.msk.f32.gmra.mrb[4].mxu1 %vm349_vm2, %v5088_v2 }
  0x89   : > { %4210 = vmatprep.mubr.msk.f32.mxu0 %vm349_vm2, %v5095_v3  ;;  %4314 = vmatprep.mubr.msk.f32.mxu1 %vm349_vm2, %v5100_v10 }
  0x8c   : > { %4211 = vmatmul.mubr.msk.f32.gmra.mrb[6].mxu0 %vm349_vm2, %v5120_v21  ;;  %4315 = vmatmul.mubr.msk.f32.gmra.mrb[6].mxu1 %vm349_vm2, %v5123_v24 }
  0x8d   : > { %4213 = vmatprep.mubr.msk.f32.mxu0 %vm349_vm2, %v5128_v32  ;;  %4317 = vmatprep.mubr.msk.f32.mxu1 %vm349_vm2, %v5131_v33 }
  0x90   : > { %4214 = vmatmul.mubr.msk.f32.gmra.mrb[8].mxu0 %vm349_vm2, %v5147_v44  ;;  %4318 = vmatmul.mubr.msk.f32.gmra.mrb[8].mxu1 %vm349_vm2, %v5150_v45 }
  0x91   : > { %4216 = vmatprep.mubr.msk.f32.mxu0 %vm349_vm2, %v5157_v49  ;;  %4320 = vmatprep.mubr.msk.f32.mxu1 %vm349_vm2, %v5161_v53 }
  0x94   : > { %4217 = vmatmul.mubr.msk.f32.gmra.mrb[10].mxu0 %vm349_vm2, %v5176_v62  ;;  %4321 = vmatmul.mubr.msk.f32.gmra.mrb[10].mxu1 %vm349_vm2, %v5179_v6 }
  0x95   : > { %4219 = vmatprep.mubr.msk.f32.mxu0 %vm349_vm2, %v5182_v9  ;;  %4323 = vmatprep.mubr.msk.f32.mxu1 %vm349_vm2, %v5185_v13 }
  0x98   : > { %4220 = vmatmul.mubr.msk.f32.gmra.mrb[12].mxu0 %vm349_vm2, %v5196_v14  ;;  %4324 = vmatmul.mubr.msk.f32.gmra.mrb[12].mxu1 %vm349_vm2, %v5199_v15 }
  0x99   : > { %4222 = vmatprep.mubr.msk.f32.mxu0 %vm349_vm2, %v5353_v34  ;;  %4326 = vmatprep.mubr.msk.f32.mxu1 %vm349_vm2, %v5435_v57 }
  0x9c   : > { %4223 = vmatmul.mubr.msk.f32.gmra.mrb[14].mxu0 %vm349_vm2, %v5364_v38  ;;  %4327 = vmatmul.mubr.msk.f32.gmra.mrb[14].mxu1 %vm349_vm2, %v5446_v60 }
  0x9d   : > { %4331 = vmatprep.mubr.msk.f32.mxu0 %vm349_vm2, %v4988_v27  ;;  %4435 = vmatprep.mubr.msk.f32.mxu1 %vm349_vm2, %v5002_v31  ;;  %v3719_v31 = vld [vmem:[%s6088_s1 + $0x2c] sm:$0xf] }
  0xa0   : > { %4332 = vmatmul.mubr.msk.f32.vlgmr.msra.gmra.mrb[16].mxu0 %vm349_vm2, %v5017_v37  ;;  %4436 = vmatmul.mubr.msk.f32.vlgmr.msra.gmra.mrb[16].mxu1 %vm349_vm2, %v5027_v42  ;;  %v3807_v42 = vld [vmem:[%s6088_s1 + $0x3c] sm:$0xf] }
  0xa1   : > { %4356 = vmatpush3.msk.msra.mxu0 %vm382_vm0, %v3665_v39  ;;  %4460 = vmatpush3.msk.msra.mxu1 %vm382_vm0, %v3753_v50 }
  0xa2   : > { %4334 = vmatprep.mubr.msk.f32.mxu0 %vm349_vm2, %v5030_v43  ;;  %4438 = vmatprep.mubr.msk.f32.mxu1 %vm349_vm2, %v5040_v48 }
  0xa3   : > { %4381 = vmatprep.subr.msk.mxu0 %vm382_vm0, %v3701_v61  ;;  %4485 = vmatprep.subr.msk.mxu1 %vm382_vm0, %v3789_v7 }
  0xa4   : > { %4335 = vmatmul.mubr.msk.f32.gmra.mrb[18].mxu0 %vm349_vm2, %v5058_v54  ;;  %4439 = vmatmul.mubr.msk.f32.gmra.mrb[18].mxu1 %vm349_vm2, %v5061_v55 }
  0xa5   : > { %4337 = vmatprep.mubr.msk.f32.mxu0 %vm349_vm2, %v5066_v58  ;;  %4441 = vmatprep.mubr.msk.f32.mxu1 %vm349_vm2, %v5069_v59 }
  0xa8   : > { %4338 = vmatmul.mubr.msk.f32.gmra.mrb[20].mxu0 %vm349_vm2, %v5085_v1  ;;  %4442 = vmatmul.mubr.msk.f32.gmra.mrb[20].mxu1 %vm349_vm2, %v5088_v2 }
  0xa9   : > { %4340 = vmatprep.mubr.msk.f32.mxu0 %vm349_vm2, %v5095_v3  ;;  %4444 = vmatprep.mubr.msk.f32.mxu1 %vm349_vm2, %v5100_v10 }
  0xac   : > { %4341 = vmatmul.mubr.msk.f32.gmra.mrb[22].mxu0 %vm349_vm2, %v5120_v21  ;;  %4445 = vmatmul.mubr.msk.f32.gmra.mrb[22].mxu1 %vm349_vm2, %v5123_v24 }
  0xad   : > { %4343 = vmatprep.mubr.msk.f32.mxu0 %vm349_vm2, %v5128_v32  ;;  %4447 = vmatprep.mubr.msk.f32.mxu1 %vm349_vm2, %v5131_v33 }
  0xb0   : > { %4344 = vmatmul.mubr.msk.f32.gmra.mrb[24].mxu0 %vm349_vm2, %v5147_v44  ;;  %4448 = vmatmul.mubr.msk.f32.gmra.mrb[24].mxu1 %vm349_vm2, %v5150_v45 }
  0xb1   : > { %4346 = vmatprep.mubr.msk.f32.mxu0 %vm349_vm2, %v5157_v49  ;;  %4450 = vmatprep.mubr.msk.f32.mxu1 %vm349_vm2, %v5161_v53 }
  0xb4   : > { %4347 = vmatmul.mubr.msk.f32.gmra.mrb[26].mxu0 %vm349_vm2, %v5176_v62  ;;  %4451 = vmatmul.mubr.msk.f32.gmra.mrb[26].mxu1 %vm349_vm2, %v5179_v6 }
  0xb5   : > { %4349 = vmatprep.mubr.msk.f32.mxu0 %vm349_vm2, %v5182_v9  ;;  %4453 = vmatprep.mubr.msk.f32.mxu1 %vm349_vm2, %v5185_v13 }
  0xb8   : > { %4350 = vmatmul.mubr.msk.f32.gmra.mrb[28].mxu0 %vm349_vm2, %v5196_v14  ;;  %4454 = vmatmul.mubr.msk.f32.gmra.mrb[28].mxu1 %vm349_vm2, %v5199_v15 }
  0xb9   : > { %4352 = vmatprep.mubr.msk.f32.mxu0 %vm349_vm2, %v5353_v34  ;;  %4456 = vmatprep.mubr.msk.f32.mxu1 %vm349_vm2, %v5435_v57 }
  0xbc   : > { %4353 = vmatmul.mubr.msk.f32.gmra.mrb[30].mxu0 %vm349_vm2, %v5364_v38  ;;  %4457 = vmatmul.mubr.msk.f32.gmra.mrb[30].mxu1 %vm349_vm2, %v5446_v60 }
  0xbd   : > { %4357 = vmatprep.mubr.msk.f32.mxu0 %vm349_vm2, %v4959_v11  ;;  %4461 = vmatprep.mubr.msk.f32.mxu1 %vm349_vm2, %v4988_v27  ;;  %v210_v11 = vld [vmem:[%s4945_s25 + $0xd8] sm:$0xff]  ;;  %v212_v27 = vld [vmem:[%s4945_s25 + $0xe8] sm:$0x3] }
  0xc0   : > { %4358 = vmatmul.mubr.msk.f32.vlgmr.msra.gmra.mrb[16].mxu0 %vm349_vm2, %v4962_v12  ;;  %4462 = vmatmul.mubr.msk.f32.vlgmr.msra.gmra.mrb[16].mxu1 %vm349_vm2, %v5017_v37  ;;  %v211_v12 = vld [vmem:[%s4945_s25 + $0xe0] sm:$0xff]  ;;  %s171_s25 = sand.u32 1, %s4816_s12   ;;  %s3848_s12 = sshll.u32 (%p4908_p5), %s4824_s14, 4 }
  0xc1   : > { %4382 = vmatpush3.msk.msra.mxu0 %vm382_vm0, %v3701_v61  ;;  %4486 = vmatpush3.msk.msra.mxu1 %vm382_vm0, %v3789_v7  ;;  %s3501_s9 = sshll.u32 %s171_s25, 9  ;;  %s3142_s23 = sadd.s32 (%p4908_p5), %s3848_s12, %s3844_s22 }
  0xc2   : > { %4360 = vmatprep.mubr.msk.f32.mxu0 %vm349_vm2, %v4974_v22  ;;  %4464 = vmatprep.mubr.msk.f32.mxu1 %vm349_vm2, %v5030_v43  ;;  %s5739_s21 = scalar_lea.vmem [#allocation2], %s3501_s9  ;;  %s3845_s24 = sshll.u32 (%p4908_p5), %s3142_s23, 3 }
  0xc3   : > { %4407 = vmatprep.subr.msk.mxu0 %vm382_vm0, %v3719_v31  ;;  %4511 = vmatprep.subr.msk.mxu1 %vm382_vm0, %v3807_v42  ;;  %s5945_s29 = scalar_lea.vmem (%p4908_p5), %s6090_s3, %s3845_s24 }
  0xc4   : > { %4361 = vmatmul.mubr.msk.f32.gmra.mrb[18].mxu0 %vm349_vm2, %v4977_v23  ;;  %4465 = vmatmul.mubr.msk.f32.gmra.mrb[18].mxu1 %vm349_vm2, %v5058_v54 }
  0xc5   : > { %4363 = vmatprep.mubr.msk.f32.mxu0 %vm349_vm2, %v4991_v29  ;;  %4467 = vmatprep.mubr.msk.f32.mxu1 %vm349_vm2, %v5066_v58 }
  0xc8   : > { %4364 = vmatmul.mubr.msk.f32.gmra.mrb[20].mxu0 %vm349_vm2, %v5007_v35  ;;  %4468 = vmatmul.mubr.msk.f32.gmra.mrb[20].mxu1 %vm349_vm2, %v5085_v1 }
  0xc9   : > { %4366 = vmatprep.mubr.msk.f32.mxu0 %vm349_vm2, %v5034_v46  ;;  %4470 = vmatprep.mubr.msk.f32.mxu1 %vm349_vm2, %v5095_v3 }
  0xcc   : > { %4367 = vmatmul.mubr.msk.f32.gmra.mrb[22].mxu0 %vm349_vm2, %v5037_v47  ;;  %4471 = vmatmul.mubr.msk.f32.gmra.mrb[22].mxu1 %vm349_vm2, %v5120_v21 }
  0xcd   : > { %4369 = vmatprep.mubr.msk.f32.mxu0 %vm349_vm2, %v5075_v63  ;;  %4473 = vmatprep.mubr.msk.f32.mxu1 %vm349_vm2, %v5128_v32 }
  0xd0   : > { %4370 = vmatmul.mubr.msk.f32.gmra.mrb[24].mxu0 %vm349_vm2, %v5078_v0  ;;  %4474 = vmatmul.mubr.msk.f32.gmra.mrb[24].mxu1 %vm349_vm2, %v5147_v44 }
  0xd1   : > { %4372 = vmatprep.mubr.msk.f32.mxu0 %vm349_vm2, %v5106_v16  ;;  %4476 = vmatprep.mubr.msk.f32.mxu1 %vm349_vm2, %v5157_v49 }
  0xd4   : > { %4373 = vmatmul.mubr.msk.f32.gmra.mrb[26].mxu0 %vm349_vm2, %v5109_v17  ;;  %4477 = vmatmul.mubr.msk.f32.gmra.mrb[26].mxu1 %vm349_vm2, %v5176_v62 }
  0xd5   : > { %4375 = vmatprep.mubr.msk.f32.mxu0 %vm349_vm2, %v5137_v40  ;;  %4479 = vmatprep.mubr.msk.f32.mxu1 %vm349_vm2, %v5182_v9 }
  0xd8   : > { %4376 = vmatmul.mubr.msk.f32.gmra.mrb[28].mxu0 %vm349_vm2, %v5140_v41  ;;  %4480 = vmatmul.mubr.msk.f32.gmra.mrb[28].mxu1 %vm349_vm2, %v5196_v14 }
  0xd9   : > { %4378 = vmatprep.mubr.msk.f32.mxu0 %vm349_vm2, %v5328_v18  ;;  %4482 = vmatprep.mubr.msk.f32.mxu1 %vm349_vm2, %v5353_v34 }
  0xdc   : > { %4379 = vmatmul.mubr.msk.f32.gmra.mrb[30].mxu0 %vm349_vm2, %v5331_v25  ;;  %4483 = vmatmul.mubr.msk.f32.gmra.mrb[30].mxu1 %vm349_vm2, %v5364_v38 }
  0xdd   : > { %4383 = vmatprep.mubr.msk.f32.mxu0 %vm349_vm2, %v4974_v22  ;;  %4487 = vmatprep.mubr.msk.f32.mxu1 %vm349_vm2, %v5030_v43  ;;  %v336_v22 = vrot.slane %v210_v11, 1 }
  0xe0   : > { %4384 = vmatmul.mubr.msk.f32.vlgmr.msra.gmra.mrb[16].mxu0 %vm349_vm2, %v4977_v23  ;;  %4488 = vmatmul.mubr.msk.f32.vlgmr.msra.gmra.mrb[16].mxu1 %vm349_vm2, %v5058_v54  ;;  %v337_v23 = vrot.slane %v211_v12, 1 }
  0xe1   : > { %4408 = vmatpush3.msk.msra.mxu0 %vm382_vm0, %v3719_v31  ;;  %4512 = vmatpush3.msk.msra.mxu1 %vm382_vm0, %v3807_v42 }
  0xe2   : > { %4386 = vmatprep.mubr.msk.f32.mxu0 %vm349_vm2, %v4991_v29  ;;  %4490 = vmatprep.mubr.msk.f32.mxu1 %vm349_vm2, %v5066_v58  ;;  %v339_v29 = vrot.slane %v212_v27, 1 }
  0xe4   : > { %4387 = vmatmul.mubr.msk.f32.gmra.mrb[18].mxu0 %vm349_vm2, %v5007_v35  ;;  %4491 = vmatmul.mubr.msk.f32.gmra.mrb[18].mxu1 %vm349_vm2, %v5085_v1  ;;  %v338_v35 = vsel %vm238_vm1, %v336_v22, %v337_v23  ;;  %v340_v37 = vsel %vm238_vm1, %v337_v23, %v339_v29 }
  0xe5   : > { %4389 = vmatprep.mubr.msk.f32.mxu0 %vm349_vm2, %v5034_v46  ;;  %4493 = vmatprep.mubr.msk.f32.mxu1 %vm349_vm2, %v5095_v3  ;;  %v342_v46 = vrot.slane %v211_v12, 2 }
  0xe8   : > { %4390 = vmatmul.mubr.msk.f32.gmra.mrb[20].mxu0 %vm349_vm2, %v5037_v47  ;;  %4494 = vmatmul.mubr.msk.f32.gmra.mrb[20].mxu1 %vm349_vm2, %v5120_v21  ;;  %v344_v47 = vrot.slane %v212_v27, 2 }
  0xe9   : > { %4392 = vmatprep.mubr.msk.f32.mxu0 %vm349_vm2, %v5075_v63  ;;  %4496 = vmatprep.mubr.msk.f32.mxu1 %vm349_vm2, %v5128_v32 }
  0xec   : > { %4393 = vmatmul.mubr.msk.f32.gmra.mrb[22].mxu0 %vm349_vm2, %v5078_v0  ;;  %4497 = vmatmul.mubr.msk.f32.gmra.mrb[22].mxu1 %vm349_vm2, %v5147_v44 }
  0xed   : > { %4395 = vmatprep.mubr.msk.f32.mxu0 %vm349_vm2, %v5106_v16  ;;  %4499 = vmatprep.mubr.msk.f32.mxu1 %vm349_vm2, %v5157_v49 }
  0xf0   : > { %4396 = vmatmul.mubr.msk.f32.gmra.mrb[24].mxu0 %vm349_vm2, %v5109_v17  ;;  %4500 = vmatmul.mubr.msk.f32.gmra.mrb[24].mxu1 %vm349_vm2, %v5176_v62 }
  0xf1   : > { %4398 = vmatprep.mubr.msk.f32.mxu0 %vm349_vm2, %v5137_v40  ;;  %4502 = vmatprep.mubr.msk.f32.mxu1 %vm349_vm2, %v5182_v9 }
  0xf4   : > { %4399 = vmatmul.mubr.msk.f32.gmra.mrb[26].mxu0 %vm349_vm2, %v5140_v41  ;;  %4503 = vmatmul.mubr.msk.f32.gmra.mrb[26].mxu1 %vm349_vm2, %v5196_v14 }
  0xf5   : > { %4401 = vmatprep.mubr.msk.f32.mxu0 %vm349_vm2, %v5328_v18  ;;  %4505 = vmatprep.mubr.msk.f32.mxu1 %vm349_vm2, %v5353_v34 }
  0xf8   : > { %4402 = vmatmul.mubr.msk.f32.gmra.mrb[28].mxu0 %vm349_vm2, %v5331_v25  ;;  %4506 = vmatmul.mubr.msk.f32.gmra.mrb[28].mxu1 %vm349_vm2, %v5364_v38 }
  0xf9   : > { %4404 = vmatprep.mubr.msk.f32.mxu0 %vm349_vm2, %v210_v11  ;;  %4508 = vmatprep.mubr.msk.f32.mxu1 %vm349_vm2, %v338_v35 }
  0xfc   : > { %4405 = vmatmul.mubr.msk.f32.gmra.mrb[30].mxu0 %vm349_vm2, %v211_v12  ;;  %4509 = vmatmul.mubr.msk.f32.gmra.mrb[30].mxu1 %vm349_vm2, %v340_v37 }
  0xfd   : > { %4409 = vmatprep.mubr.msk.f32.mxu0 %vm349_vm2, %v5030_v43  ;;  %4513 = vmatprep.mubr.msk.f32.mxu1 %vm349_vm2, %v5040_v48  ;;  %v341_v43 = vrot.slane %v210_v11, 2 }
  0xff   : > { %v343_v48 = vsel %vm279_vm3, %v341_v43, %v342_v46 }
 0x100   : > { %4410 = vmatmul.mubr.msk.f32.vlgmr.msra.gmra.mrb[16].mxu0 %vm349_vm2, %v5058_v54  ;;  %4514 = vmatmul.mubr.msk.f32.vlgmr.msra.gmra.mrb[16].mxu1 %vm349_vm2, %v5061_v55  ;;  %v345_v54 = vsel %vm279_vm3, %v342_v46, %v344_v47  ;;  %v5733_v55 = vld [vmem:[%s6089_s2] ss:$0 sm:$0xff] }
 0x101   : > { %4412 = vmatprep.mubr.msk.f32.mxu0 %vm349_vm2, %v5066_v58  ;;  %4516 = vmatprep.mubr.msk.f32.mxu1 %vm349_vm2, %v5069_v59 }
 0x104   : > { %4413 = vmatmul.mubr.msk.f32.gmra.mrb[18].mxu0 %vm349_vm2, %v5085_v1  ;;  %4517 = vmatmul.mubr.msk.f32.gmra.mrb[18].mxu1 %vm349_vm2, %v5088_v2 }
 0x105   : > { %4415 = vmatprep.mubr.msk.f32.mxu0 %vm349_vm2, %v5095_v3  ;;  %4519 = vmatprep.mubr.msk.f32.mxu1 %vm349_vm2, %v5100_v10 }
 0x108   : > { %4416 = vmatmul.mubr.msk.f32.gmra.mrb[20].mxu0 %vm349_vm2, %v5120_v21  ;;  %4520 = vmatmul.mubr.msk.f32.gmra.mrb[20].mxu1 %vm349_vm2, %v5123_v24 }
 0x109   : > { %4418 = vmatprep.mubr.msk.f32.mxu0 %vm349_vm2, %v5128_v32  ;;  %4522 = vmatprep.mubr.msk.f32.mxu1 %vm349_vm2, %v5131_v33 }
 0x10c   : > { %4419 = vmatmul.mubr.msk.f32.gmra.mrb[22].mxu0 %vm349_vm2, %v5147_v44  ;;  %4523 = vmatmul.mubr.msk.f32.gmra.mrb[22].mxu1 %vm349_vm2, %v5150_v45 }
 0x10d   : > { %4421 = vmatprep.mubr.msk.f32.mxu0 %vm349_vm2, %v5157_v49  ;;  %4525 = vmatprep.mubr.msk.f32.mxu1 %vm349_vm2, %v5161_v53 }
 0x110   : > { %4422 = vmatmul.mubr.msk.f32.gmra.mrb[24].mxu0 %vm349_vm2, %v5176_v62  ;;  %4526 = vmatmul.mubr.msk.f32.gmra.mrb[24].mxu1 %vm349_vm2, %v5179_v6 }
 0x111   : > { %4424 = vmatprep.mubr.msk.f32.mxu0 %vm349_vm2, %v5182_v9  ;;  %4528 = vmatprep.mubr.msk.f32.mxu1 %vm349_vm2, %v5185_v13 }
 0x114   : > { %4425 = vmatmul.mubr.msk.f32.gmra.mrb[26].mxu0 %vm349_vm2, %v5196_v14  ;;  %4529 = vmatmul.mubr.msk.f32.gmra.mrb[26].mxu1 %vm349_vm2, %v5199_v15 }
 0x115   : > { %4427 = vmatprep.mubr.msk.f32.mxu0 %vm349_vm2, %v5353_v34  ;;  %4531 = vmatprep.mubr.msk.f32.mxu1 %vm349_vm2, %v5435_v57 }
 0x118   : > { %4428 = vmatmul.mubr.msk.f32.gmra.mrb[28].mxu0 %vm349_vm2, %v5364_v38  ;;  %4532 = vmatmul.mubr.msk.f32.gmra.mrb[28].mxu1 %vm349_vm2, %v5446_v60 }
 0x119   : > { %4430 = vmatprep.mubr.msk.f32.mxu0 %vm349_vm2, %v338_v35  ;;  %4534 = vmatprep.mubr.msk.f32.mxu1 %vm349_vm2, %v343_v48 }
 0x11c   : > { %4431 = vmatmul.mubr.msk.f32.gmra.mrb[30].mxu0 %vm349_vm2, %v340_v37  ;;  %4535 = vmatmul.mubr.msk.f32.gmra.mrb[30].mxu1 %vm349_vm2, %v345_v54 }
 0x153   : > { %v4203_v58 = vpop.f32.mrb[0].mxu0  ;;  %v4307_v59 = vpop.f32.mrb[0].mxu1 }
 0x154   : > { %v1058_v63 = vadd.f32 %v4203_v58, %v5733_v55  ;;  %v1758_v0 = vadd.f32 %v4307_v59, %v5733_v55  ;;  %v956_v1 = vpop.f32.mrb[1].mxu0  ;;  %v1662_v2 = vpop.f32.mrb[1].mxu1 }
 0x155   : > { %v1057_v3 = vadd.f32 %v5733_v55, %v956_v1  ;;  %v1757_v10 = vadd.f32 %v5733_v55, %v1662_v2 }
 0x156   : > { %1074 = vst.msk [vmem:[%s5739_s21 + $0x8] sm:$0xff] %vm349_vm2, %v1058_v63  ;;  %3650 = vst.msk [vmem:[%s5739_s21 + $0x88] sm:$0xff] %vm349_vm2, %v1758_v0 }
 0x157   : > { %1073 = vst.msk [vmem:[%s5739_s21] sm:$0xff] %vm349_vm2, %v1057_v3  ;;  %3649 = vst.msk [vmem:[%s5739_s21 + $0x80] sm:$0xff] %vm349_vm2, %v1757_v10  ;;  %v4206_v16 = vpop.f32.mrb[2].mxu0  ;;  %v4310_v17 = vpop.f32.mrb[2].mxu1 }
 0x158   : > { %v1060_v21 = vadd.f32 %v4206_v16, %v5733_v55  ;;  %v1760_v24 = vadd.f32 %v4310_v17, %v5733_v55  ;;  %v966_v32 = vpop.f32.mrb[3].mxu0  ;;  %v1672_v33 = vpop.f32.mrb[3].mxu1 }
 0x159   : > { %v1059_v40 = vadd.f32 %v5733_v55, %v966_v32  ;;  %v1759_v41 = vadd.f32 %v5733_v55, %v1672_v33 }
 0x15a   : > { %1076 = vst.msk [vmem:[%s5739_s21 + $0x18] sm:$0xff] %vm349_vm2, %v1060_v21  ;;  %3652 = vst.msk [vmem:[%s5739_s21 + $0x98] sm:$0xff] %vm349_vm2, %v1760_v24 }
 0x15b   : > { %1075 = vst.msk [vmem:[%s5739_s21 + $0x10] sm:$0xff] %vm349_vm2, %v1059_v40  ;;  %3651 = vst.msk [vmem:[%s5739_s21 + $0x90] sm:$0xff] %vm349_vm2, %v1759_v41  ;;  %v4209_v44 = vpop.f32.mrb[4].mxu0  ;;  %v4313_v45 = vpop.f32.mrb[4].mxu1 }
 0x15c   : > { %v1062_v49 = vadd.f32 %v4209_v44, %v5733_v55  ;;  %v1762_v53 = vadd.f32 %v4313_v45, %v5733_v55  ;;  %v976_v62 = vpop.f32.mrb[5].mxu0  ;;  %v1682_v6 = vpop.f32.mrb[5].mxu1 }
 0x15d   : > { %v1061_v8 = vadd.f32 %v5733_v55, %v976_v62  ;;  %v1761_v9 = vadd.f32 %v5733_v55, %v1682_v6 }
 0x15e   : > { %1078 = vst.msk [vmem:[%s5739_s21 + $0x28] sm:$0xff] %vm349_vm2, %v1062_v49  ;;  %3654 = vst.msk [vmem:[%s5739_s21 + $0xa8] sm:$0xff] %vm349_vm2, %v1762_v53 }
 0x15f   : > { %1077 = vst.msk [vmem:[%s5739_s21 + $0x20] sm:$0xff] %vm349_vm2, %v1061_v8  ;;  %3653 = vst.msk [vmem:[%s5739_s21 + $0xa0] sm:$0xff] %vm349_vm2, %v1761_v9  ;;  %v4212_v13 = vpop.f32.mrb[6].mxu0  ;;  %v4316_v14 = vpop.f32.mrb[6].mxu1 }
 0x160   : > { %v1064_v15 = vadd.f32 %v4212_v13, %v5733_v55  ;;  %v1764_v19 = vadd.f32 %v4316_v14, %v5733_v55  ;;  %v986_v20 = vpop.f32.mrb[7].mxu0  ;;  %v1692_v4 = vpop.f32.mrb[7].mxu1 }
 0x161   : > { %v1063_v5 = vadd.f32 %v5733_v55, %v986_v20  ;;  %v1763_v18 = vadd.f32 %v5733_v55, %v1692_v4 }
 0x162   : > { %1080 = vst.msk [vmem:[%s5739_s21 + $0x38] sm:$0xff] %vm349_vm2, %v1064_v15  ;;  %3656 = vst.msk [vmem:[%s5739_s21 + $0xb8] sm:$0xff] %vm349_vm2, %v1764_v19 }
 0x163   : > { %1079 = vst.msk [vmem:[%s5739_s21 + $0x30] sm:$0xff] %vm349_vm2, %v1063_v5  ;;  %3655 = vst.msk [vmem:[%s5739_s21 + $0xb0] sm:$0xff] %vm349_vm2, %v1763_v18  ;;  %v4215_v25 = vpop.f32.mrb[8].mxu0  ;;  %v4319_v30 = vpop.f32.mrb[8].mxu1 }
 0x164   : > { %v1066_v36 = vadd.f32 %v4215_v25, %v5733_v55  ;;  %v1766_v26 = vadd.f32 %v4319_v30, %v5733_v55  ;;  %v996_v28 = vpop.f32.mrb[9].mxu0  ;;  %v1702_v34 = vpop.f32.mrb[9].mxu1 }
 0x165   : > { %v1065_v38 = vadd.f32 %v5733_v55, %v996_v28  ;;  %v1765_v39 = vadd.f32 %v5733_v55, %v1702_v34 }
 0x166   : > { %1082 = vst.msk [vmem:[%s5739_s21 + $0x48] sm:$0xff] %vm349_vm2, %v1066_v36  ;;  %3658 = vst.msk [vmem:[%s5739_s21 + $0xc8] sm:$0xff] %vm349_vm2, %v1766_v26 }
 0x167   : > { %1081 = vst.msk [vmem:[%s5739_s21 + $0x40] sm:$0xff] %vm349_vm2, %v1065_v38  ;;  %3657 = vst.msk [vmem:[%s5739_s21 + $0xc0] sm:$0xff] %vm349_vm2, %v1765_v39  ;;  %v4218_v50 = vpop.f32.mrb[10].mxu0  ;;  %v4322_v51 = vpop.f32.mrb[10].mxu1 }
 0x168   : > { %v1068_v52 = vadd.f32 %v4218_v50, %v5733_v55  ;;  %v1768_v56 = vadd.f32 %v4322_v51, %v5733_v55  ;;  %v1006_v57 = vpop.f32.mrb[11].mxu0  ;;  %v1712_v60 = vpop.f32.mrb[11].mxu1 }
 0x169   : > { %v1067_v61 = vadd.f32 %v5733_v55, %v1006_v57  ;;  %v1767_v7 = vadd.f32 %v5733_v55, %v1712_v60 }
 0x16a   : > { %1084 = vst.msk [vmem:[%s5739_s21 + $0x58] sm:$0xff] %vm349_vm2, %v1068_v52  ;;  %3660 = vst.msk [vmem:[%s5739_s21 + $0xd8] sm:$0xff] %vm349_vm2, %v1768_v56 }
 0x16b   : > { %1083 = vst.msk [vmem:[%s5739_s21 + $0x50] sm:$0xff] %vm349_vm2, %v1067_v61  ;;  %3659 = vst.msk [vmem:[%s5739_s21 + $0xd0] sm:$0xff] %vm349_vm2, %v1767_v7  ;;  %v4221_v31 = vpop.f32.mrb[12].mxu0  ;;  %v4325_v42 = vpop.f32.mrb[12].mxu1 }
 0x16c   : > { %v1070_v11 = vadd.f32 %v4221_v31, %v5733_v55  ;;  %v1770_v12 = vadd.f32 %v4325_v42, %v5733_v55  ;;  %v1016_v22 = vpop.f32.mrb[13].mxu0  ;;  %v1722_v23 = vpop.f32.mrb[13].mxu1 }
 0x16d   : > { %v1069_v27 = vadd.f32 %v5733_v55, %v1016_v22  ;;  %v1769_v29 = vadd.f32 %v5733_v55, %v1722_v23 }
 0x16e   : > { %1086 = vst.msk [vmem:[%s5739_s21 + $0x68] sm:$0xff] %vm349_vm2, %v1070_v11  ;;  %3662 = vst.msk [vmem:[%s5739_s21 + $0xe8] sm:$0xff] %vm349_vm2, %v1770_v12 }
 0x16f   : > { %1085 = vst.msk [vmem:[%s5739_s21 + $0x60] sm:$0xff] %vm349_vm2, %v1069_v27  ;;  %3661 = vst.msk [vmem:[%s5739_s21 + $0xe0] sm:$0xff] %vm349_vm2, %v1769_v29  ;;  %v4224_v35 = vpop.f32.mrb[14].mxu0  ;;  %v4328_v37 = vpop.f32.mrb[14].mxu1 }
 0x170   : > { %v1072_v43 = vadd.f32 %v4224_v35, %v5733_v55  ;;  %v1772_v46 = vadd.f32 %v4328_v37, %v5733_v55  ;;  %v1026_v47 = vpop.f32.mrb[15].mxu0  ;;  %v1732_v48 = vpop.f32.mrb[15].mxu1 }
 0x171   : > { %v1071_v54 = vadd.f32 %v5733_v55, %v1026_v47  ;;  %v1771_v58 = vadd.f32 %v5733_v55, %v1732_v48 }
 0x172   : > { %1088 = vst.msk [vmem:[%s5739_s21 + $0x78] sm:$0xff] %vm349_vm2, %v1072_v43  ;;  %3664 = vst.msk [vmem:[%s5739_s21 + $0xf8] sm:$0xff] %vm349_vm2, %v1772_v46 }
 0x173   : > { %1087 = vst.msk [vmem:[%s5739_s21 + $0x70] sm:$0xff] %vm349_vm2, %v1071_v54  ;;  %3663 = vst.msk [vmem:[%s5739_s21 + $0xf0] sm:$0xff] %vm349_vm2, %v1771_v58 }
 0x1d3   : > { %v4411_v59 = vpop.f32.mrb[16].mxu0  ;;  %v4515_v63 = vpop.f32.mrb[16].mxu1 }
 0x1d4   : > { %v2431_v0 = vadd.f32 %v4411_v59, %v5733_v55  ;;  %v3100_v1 = vadd.f32 %v4515_v63, %v5733_v55  ;;  %v2335_v2 = vpop.f32.mrb[17].mxu0  ;;  %v3004_v3 = vpop.f32.mrb[17].mxu1  ;;  %v3300_v63 = vld [vmem:[%s5739_s21 + $0x8] sm:$0xff] (%p4908_p5) }
 0x1d5   : > { %v2430_v10 = vadd.f32 %v5733_v55, %v2335_v2  ;;  %v3099_v16 = vadd.f32 %v5733_v55, %v3004_v3  ;;  %v3306_v2 = vld [vmem:[%s5739_s21 + $0x20] sm:$0xff] (%p4908_p5)  ;;  %v3308_v3 = vld [vmem:[%s5739_s21 + $0x28] sm:$0xff] (%p4908_p5)  ;;  %3301 = vst [vmem:[%s5945_s29 + $0x8] sm:$0xff] (%p4908_p5), %v3300_v63 }
 0x1d6   : > { %3738 = vst.msk [vmem:[%s5739_s21 + $0x108] sm:$0xff] %vm349_vm2, %v2431_v0  ;;  %3826 = vst.msk [vmem:[%s5739_s21 + $0x188] sm:$0xff] %vm349_vm2, %v3100_v1  ;;  %v3302_v0 = vld [vmem:[%s5739_s21 + $0x10] sm:$0xff] (%p4908_p5)  ;;  %v3304_v1 = vld [vmem:[%s5739_s21 + $0x18] sm:$0xff] (%p4908_p5) }
 0x1d7   : > { %3737 = vst.msk [vmem:[%s5739_s21 + $0x100] sm:$0xff] %vm349_vm2, %v2430_v10  ;;  %3825 = vst.msk [vmem:[%s5739_s21 + $0x180] sm:$0xff] %vm349_vm2, %v3099_v16  ;;  %v4414_v17 = vpop.f32.mrb[18].mxu0  ;;  %v4518_v21 = vpop.f32.mrb[18].mxu1  ;;  %v3310_v10 = vld [vmem:[%s5739_s21 + $0x30] sm:$0xff] (%p4908_p5)  ;;  %v3312_v16 = vld [vmem:[%s5739_s21 + $0x38] sm:$0xff] (%p4908_p5) }
 0x1d8   : > { %v2433_v24 = vadd.f32 %v4414_v17, %v5733_v55  ;;  %v3102_v32 = vadd.f32 %v4518_v21, %v5733_v55  ;;  %v2345_v33 = vpop.f32.mrb[19].mxu0  ;;  %v3014_v40 = vpop.f32.mrb[19].mxu1  ;;  %v3314_v17 = vld [vmem:[%s5739_s21 + $0x40] sm:$0xff] (%p4908_p5)  ;;  %v3316_v21 = vld [vmem:[%s5739_s21 + $0x48] sm:$0xff] (%p4908_p5)  ;;  %3303 = vst [vmem:[%s5945_s29 + $0x10] sm:$0xff] (%p4908_p5), %v3302_v0  ;;  %3305 = vst [vmem:[%s5945_s29 + $0x18] sm:$0xff] (%p4908_p5), %v3304_v1 }
 0x1d9   : > { %v2432_v41 = vadd.f32 %v5733_v55, %v2345_v33  ;;  %v3101_v44 = vadd.f32 %v5733_v55, %v3014_v40  ;;  %3307 = vst [vmem:[%s5945_s29 + $0x20] sm:$0xff] (%p4908_p5), %v3306_v2  ;;  %3309 = vst [vmem:[%s5945_s29 + $0x28] sm:$0xff] (%p4908_p5), %v3308_v3  ;;  %v3322_v33 = vld [vmem:[%s5739_s21 + $0x60] sm:$0xff] (%p4908_p5)  ;;  %v3324_v40 = vld [vmem:[%s5739_s21 + $0x68] sm:$0xff] (%p4908_p5) }
 0x1da   : > { %3740 = vst.msk [vmem:[%s5739_s21 + $0x118] sm:$0xff] %vm349_vm2, %v2433_v24  ;;  %3828 = vst.msk [vmem:[%s5739_s21 + $0x198] sm:$0xff] %vm349_vm2, %v3102_v32  ;;  %v3318_v24 = vld [vmem:[%s5739_s21 + $0x50] sm:$0xff] (%p4908_p5)  ;;  %v3320_v32 = vld [vmem:[%s5739_s21 + $0x58] sm:$0xff] (%p4908_p5) }
 0x1db   : > { %3739 = vst.msk [vmem:[%s5739_s21 + $0x110] sm:$0xff] %vm349_vm2, %v2432_v41  ;;  %3827 = vst.msk [vmem:[%s5739_s21 + $0x190] sm:$0xff] %vm349_vm2, %v3101_v44  ;;  %v4417_v45 = vpop.f32.mrb[20].mxu0  ;;  %v4521_v49 = vpop.f32.mrb[20].mxu1  ;;  %v3326_v41 = vld [vmem:[%s5739_s21 + $0x70] sm:$0xff] (%p4908_p5)  ;;  %v3328_v44 = vld [vmem:[%s5739_s21 + $0x78] sm:$0xff] (%p4908_p5) }
 0x1dc   : > { %v2435_v53 = vadd.f32 %v4417_v45, %v5733_v55  ;;  %v3104_v62 = vadd.f32 %v4521_v49, %v5733_v55  ;;  %v2355_v6 = vpop.f32.mrb[21].mxu0  ;;  %v3024_v8 = vpop.f32.mrb[21].mxu1  ;;  %3311 = vst [vmem:[%s5945_s29 + $0x30] sm:$0xff] (%p4908_p5), %v3310_v10  ;;  %3313 = vst [vmem:[%s5945_s29 + $0x38] sm:$0xff] (%p4908_p5), %v3312_v16  ;;  %v3330_v45 = vld [vmem:[%s5739_s21 + $0x80] sm:$0xff] (%p4908_p5)  ;;  %v3332_v49 = vld [vmem:[%s5739_s21 + $0x88] sm:$0xff] (%p4908_p5) }
 0x1dd   : > { %v2434_v9 = vadd.f32 %v5733_v55, %v2355_v6  ;;  %v3103_v13 = vadd.f32 %v5733_v55, %v3024_v8  ;;  %3315 = vst [vmem:[%s5945_s29 + $0x40] sm:$0xff] (%p4908_p5), %v3314_v17  ;;  %3317 = vst [vmem:[%s5945_s29 + $0x48] sm:$0xff] (%p4908_p5), %v3316_v21  ;;  %v3338_v6 = vld [vmem:[%s5739_s21 + $0xa0] sm:$0xff] (%p4908_p5)  ;;  %v3340_v8 = vld [vmem:[%s5739_s21 + $0xa8] sm:$0xff] (%p4908_p5) }
 0x1de   : > { %3742 = vst.msk [vmem:[%s5739_s21 + $0x128] sm:$0xff] %vm349_vm2, %v2435_v53  ;;  %3830 = vst.msk [vmem:[%s5739_s21 + $0x1a8] sm:$0xff] %vm349_vm2, %v3104_v62  ;;  %v3334_v53 = vld [vmem:[%s5739_s21 + $0x90] sm:$0xff] (%p4908_p5)  ;;  %v3336_v62 = vld [vmem:[%s5739_s21 + $0x98] sm:$0xff] (%p4908_p5) }
 0x1df   : > { %3741 = vst.msk [vmem:[%s5739_s21 + $0x120] sm:$0xff] %vm349_vm2, %v2434_v9  ;;  %3829 = vst.msk [vmem:[%s5739_s21 + $0x1a0] sm:$0xff] %vm349_vm2, %v3103_v13  ;;  %v4420_v14 = vpop.f32.mrb[22].mxu0  ;;  %v4524_v15 = vpop.f32.mrb[22].mxu1  ;;  %v3342_v9 = vld [vmem:[%s5739_s21 + $0xb0] sm:$0xff] (%p4908_p5)  ;;  %v3344_v13 = vld [vmem:[%s5739_s21 + $0xb8] sm:$0xff] (%p4908_p5) }
 0x1e0   : > { %v2437_v19 = vadd.f32 %v4420_v14, %v5733_v55  ;;  %v3106_v20 = vadd.f32 %v4524_v15, %v5733_v55  ;;  %v2365_v4 = vpop.f32.mrb[23].mxu0  ;;  %v3034_v5 = vpop.f32.mrb[23].mxu1  ;;  %3319 = vst [vmem:[%s5945_s29 + $0x50] sm:$0xff] (%p4908_p5), %v3318_v24  ;;  %3321 = vst [vmem:[%s5945_s29 + $0x58] sm:$0xff] (%p4908_p5), %v3320_v32  ;;  %v3346_v14 = vld [vmem:[%s5739_s21 + $0xc0] sm:$0xff] (%p4908_p5)  ;;  %v3348_v15 = vld [vmem:[%s5739_s21 + $0xc8] sm:$0xff] (%p4908_p5) }
 0x1e1   : > { %v2436_v18 = vadd.f32 %v5733_v55, %v2365_v4  ;;  %v3105_v25 = vadd.f32 %v5733_v55, %v3034_v5  ;;  %3323 = vst [vmem:[%s5945_s29 + $0x60] sm:$0xff] (%p4908_p5), %v3322_v33  ;;  %3325 = vst [vmem:[%s5945_s29 + $0x68] sm:$0xff] (%p4908_p5), %v3324_v40  ;;  %v3354_v4 = vld [vmem:[%s5739_s21 + $0xe0] sm:$0xff] (%p4908_p5)  ;;  %v3356_v5 = vld [vmem:[%s5739_s21 + $0xe8] sm:$0xff] (%p4908_p5) }
 0x1e2   : > { %3744 = vst.msk [vmem:[%s5739_s21 + $0x138] sm:$0xff] %vm349_vm2, %v2437_v19  ;;  %3832 = vst.msk [vmem:[%s5739_s21 + $0x1b8] sm:$0xff] %vm349_vm2, %v3106_v20  ;;  %v3350_v19 = vld [vmem:[%s5739_s21 + $0xd0] sm:$0xff] (%p4908_p5)  ;;  %v3352_v20 = vld [vmem:[%s5739_s21 + $0xd8] sm:$0xff] (%p4908_p5) }
 0x1e3   : > { %3743 = vst.msk [vmem:[%s5739_s21 + $0x130] sm:$0xff] %vm349_vm2, %v2436_v18  ;;  %3831 = vst.msk [vmem:[%s5739_s21 + $0x1b0] sm:$0xff] %vm349_vm2, %v3105_v25  ;;  %v4423_v30 = vpop.f32.mrb[24].mxu0  ;;  %v4527_v36 = vpop.f32.mrb[24].mxu1  ;;  %v3358_v18 = vld [vmem:[%s5739_s21 + $0xf0] sm:$0xff] (%p4908_p5)  ;;  %v3360_v25 = vld [vmem:[%s5739_s21 + $0xf8] sm:$0xff] (%p4908_p5) }
 0x1e4   : > { %v2439_v26 = vadd.f32 %v4423_v30, %v5733_v55  ;;  %v3108_v28 = vadd.f32 %v4527_v36, %v5733_v55  ;;  %v2375_v34 = vpop.f32.mrb[25].mxu0  ;;  %v3044_v38 = vpop.f32.mrb[25].mxu1  ;;  %3327 = vst [vmem:[%s5945_s29 + $0x70] sm:$0xff] (%p4908_p5), %v3326_v41  ;;  %3329 = vst [vmem:[%s5945_s29 + $0x78] sm:$0xff] (%p4908_p5), %v3328_v44  ;;  %v3362_v30 = vld [vmem:[%s5739_s21 + $0x100] sm:$0xff] (%p4908_p5)  ;;  %v3364_v36 = vld [vmem:[%s5739_s21 + $0x108] sm:$0xff] (%p4908_p5) }
 0x1e5   : > { %v2438_v39 = vadd.f32 %v5733_v55, %v2375_v34  ;;  %v3107_v50 = vadd.f32 %v5733_v55, %v3044_v38  ;;  %3331 = vst [vmem:[%s5945_s29 + $0x100] sm:$0xff] (%p4908_p5), %v3330_v45  ;;  %3333 = vst [vmem:[%s5945_s29 + $0x108] sm:$0xff] (%p4908_p5), %v3332_v49  ;;  %v3372_v38 = vld [vmem:[%s5739_s21 + $0x128] sm:$0xff] (%p4908_p5) }
 0x1e6   : > { %3746 = vst.msk [vmem:[%s5739_s21 + $0x148] sm:$0xff] %vm349_vm2, %v2439_v26  ;;  %3834 = vst.msk [vmem:[%s5739_s21 + $0x1c8] sm:$0xff] %vm349_vm2, %v3108_v28  ;;  %v3366_v26 = vld [vmem:[%s5739_s21 + $0x110] sm:$0xff] (%p4908_p5)  ;;  %v3368_v28 = vld [vmem:[%s5739_s21 + $0x118] sm:$0xff] (%p4908_p5) }
 0x1e7   : > { %3745 = vst.msk [vmem:[%s5739_s21 + $0x140] sm:$0xff] %vm349_vm2, %v2438_v39  ;;  %3833 = vst.msk [vmem:[%s5739_s21 + $0x1c0] sm:$0xff] %vm349_vm2, %v3107_v50  ;;  %v4426_v51 = vpop.f32.mrb[26].mxu0  ;;  %v4530_v52 = vpop.f32.mrb[26].mxu1  ;;  %v3370_v34 = vld [vmem:[%s5739_s21 + $0x120] sm:$0xff] (%p4908_p5) }
 0x1e8   : > { %v2441_v56 = vadd.f32 %v4426_v51, %v5733_v55  ;;  %v3110_v57 = vadd.f32 %v4530_v52, %v5733_v55  ;;  %v2385_v60 = vpop.f32.mrb[27].mxu0  ;;  %v3054_v61 = vpop.f32.mrb[27].mxu1  ;;  %3335 = vst [vmem:[%s5945_s29 + $0x110] sm:$0xff] (%p4908_p5), %v3334_v53  ;;  %3337 = vst [vmem:[%s5945_s29 + $0x118] sm:$0xff] (%p4908_p5), %v3336_v62 }
 0x1e9   : > { %v2440_v7 = vadd.f32 %v5733_v55, %v2385_v60  ;;  %v3109_v31 = vadd.f32 %v5733_v55, %v3054_v61  ;;  %3339 = vst [vmem:[%s5945_s29 + $0x120] sm:$0xff] (%p4908_p5), %v3338_v6  ;;  %3341 = vst [vmem:[%s5945_s29 + $0x128] sm:$0xff] (%p4908_p5), %v3340_v8  ;;  %v3376_v50 = vld [vmem:[%s5739_s21 + $0x138] sm:$0xff] (%p4908_p5) }
 0x1ea   : > { %3748 = vst.msk [vmem:[%s5739_s21 + $0x158] sm:$0xff] %vm349_vm2, %v2441_v56  ;;  %3836 = vst.msk [vmem:[%s5739_s21 + $0x1d8] sm:$0xff] %vm349_vm2, %v3110_v57  ;;  %v3374_v39 = vld [vmem:[%s5739_s21 + $0x130] sm:$0xff] (%p4908_p5) }
 0x1eb   : > { %3747 = vst.msk [vmem:[%s5739_s21 + $0x150] sm:$0xff] %vm349_vm2, %v2440_v7  ;;  %3835 = vst.msk [vmem:[%s5739_s21 + $0x1d0] sm:$0xff] %vm349_vm2, %v3109_v31  ;;  %v4429_v42 = vpop.f32.mrb[28].mxu0  ;;  %v4533_v11 = vpop.f32.mrb[28].mxu1 }
 0x1ec   : > { %v2443_v12 = vadd.f32 %v4429_v42, %v5733_v55  ;;  %v3112_v22 = vadd.f32 %v4533_v11, %v5733_v55  ;;  %v2395_v23 = vpop.f32.mrb[29].mxu0  ;;  %v3064_v27 = vpop.f32.mrb[29].mxu1  ;;  %3343 = vst [vmem:[%s5945_s29 + $0x130] sm:$0xff] (%p4908_p5), %v3342_v9  ;;  %3345 = vst [vmem:[%s5945_s29 + $0x138] sm:$0xff] (%p4908_p5), %v3344_v13  ;;  %v3394_v42 = vld [vmem:[%s5739_s21 + $0x180] sm:$0xff] (%p4908_p5)  ;;  %v3396_v11 = vld [vmem:[%s5739_s21 + $0x188] sm:$0xff] (%p4908_p5) }
 0x1ed   : > { %v2442_v29 = vadd.f32 %v5733_v55, %v2395_v23  ;;  %v3111_v35 = vadd.f32 %v5733_v55, %v3064_v27  ;;  %3138 = sbr.rel (!%p4908_p5) target bundleno = 518 (0x206), region = 36  ;;  %3347 = vst [vmem:[%s5945_s29 + $0x140] sm:$0xff] (%p4908_p5), %v3346_v14  ;;  %3349 = vst [vmem:[%s5945_s29 + $0x148] sm:$0xff] (%p4908_p5), %v3348_v15  ;;  %v3380_v52 = vld [vmem:[%s5739_s21 + $0x148] sm:$0xff] (%p4908_p5)  ;;  %v3402_v23 = vld [vmem:[%s5739_s21 + $0x1a0] sm:$0xff] (%p4908_p5) }
 0x1ee   : > { %3750 = vst.msk [vmem:[%s5739_s21 + $0x168] sm:$0xff] %vm349_vm2, %v2443_v12  ;;  %3838 = vst.msk [vmem:[%s5739_s21 + $0x1e8] sm:$0xff] %vm349_vm2, %v3112_v22  ;;  %v3378_v51 = vld [vmem:[%s5739_s21 + $0x140] sm:$0xff] (%p4908_p5)  ;;  %v3398_v12 = vld [vmem:[%s5739_s21 + $0x190] sm:$0xff] (%p4908_p5) }
 0x1ef   : > { %3749 = vst.msk [vmem:[%s5739_s21 + $0x160] sm:$0xff] %vm349_vm2, %v2442_v29  ;;  %3837 = vst.msk [vmem:[%s5739_s21 + $0x1e0] sm:$0xff] %vm349_vm2, %v3111_v35  ;;  %v4432_v37 = vpop.f32.mrb[30].mxu0  ;;  %v4536_v43 = vpop.f32.mrb[30].mxu1  ;;  %v3400_v22 = vld [vmem:[%s5739_s21 + $0x198] sm:$0xff] (%p4908_p5)  ;;  %v3404_v27 = vld [vmem:[%s5739_s21 + $0x1a8] sm:$0xff] (%p4908_p5) }
 0x1f0   : > { %v2445_v46 = vadd.f32 %v4432_v37, %v5733_v55  ;;  %v3114_v47 = vadd.f32 %v4536_v43, %v5733_v55  ;;  %v2405_v48 = vpop.f32.mrb[31].mxu0  ;;  %v3074_v54 = vpop.f32.mrb[31].mxu1  ;;  %3351 = vst [vmem:[%s5945_s29 + $0x150] sm:$0xff] (%p4908_p5), %v3350_v19  ;;  %3353 = vst [vmem:[%s5945_s29 + $0x158] sm:$0xff] (%p4908_p5), %v3352_v20  ;;  %v3406_v29 = vld [vmem:[%s5739_s21 + $0x1b0] sm:$0xff] (%p4908_p5)  ;;  %v3408_v35 = vld [vmem:[%s5739_s21 + $0x1b8] sm:$0xff] (%p4908_p5) }
 0x1f1   : > { %v2444_v58 = vadd.f32 %v5733_v55, %v2405_v48  ;;  %v3113_v59 = vadd.f32 %v5733_v55, %v3074_v54  ;;  %v3298_v55 = vld [vmem:[%s5739_s21] sm:$0xff] (%p4908_p5)  ;;  %3355 = vst [vmem:[%s5945_s29 + $0x160] sm:$0xff] (%p4908_p5), %v3354_v4  ;;  %3357 = vst [vmem:[%s5945_s29 + $0x168] sm:$0xff] (%p4908_p5), %v3356_v5  ;;  %v3384_v57 = vld [vmem:[%s5739_s21 + $0x158] sm:$0xff] (%p4908_p5) }
 0x1f2   : > { %3752 = vst.msk [vmem:[%s5739_s21 + $0x178] sm:$0xff] %vm349_vm2, %v2445_v46  ;;  %3840 = vst.msk [vmem:[%s5739_s21 + $0x1f8] sm:$0xff] %vm349_vm2, %v3114_v47  ;;  %v3382_v56 = vld [vmem:[%s5739_s21 + $0x150] sm:$0xff] (%p4908_p5)  ;;  %v3410_v37 = vld [vmem:[%s5739_s21 + $0x1c0] sm:$0xff] (%p4908_p5) }
 0x1f3   : > { %3751 = vst.msk [vmem:[%s5739_s21 + $0x170] sm:$0xff] %vm349_vm2, %v2444_v58  ;;  %3839 = vst.msk [vmem:[%s5739_s21 + $0x1f0] sm:$0xff] %vm349_vm2, %v3113_v59  ;;  %v3412_v43 = vld [vmem:[%s5739_s21 + $0x1c8] sm:$0xff] (%p4908_p5)  ;;  %v3414_v46 = vld [vmem:[%s5739_s21 + $0x1d0] sm:$0xff] (%p4908_p5) }
 0x1f4   : > { %3299 = vst [vmem:[%s5945_s29] sm:$0xff] %v3298_v55  ;;  %3359 = vst [vmem:[%s5945_s29 + $0x170] sm:$0xff] %v3358_v18  ;;  %v3416_v47 = vld [vmem:[%s5739_s21 + $0x1d8] sm:$0xff] }
 0x1f5   : > { %3361 = vst [vmem:[%s5945_s29 + $0x178] sm:$0xff] %v3360_v25  ;;  %3363 = vst [vmem:[%s5945_s29 + $0x200] sm:$0xff] %v3362_v30  ;;  %v3388_v61 = vld [vmem:[%s5739_s21 + $0x168] sm:$0xff] }
 0x1f6   : > { %3365 = vst [vmem:[%s5945_s29 + $0x208] sm:$0xff] %v3364_v36  ;;  %3367 = vst [vmem:[%s5945_s29 + $0x210] sm:$0xff] %v3366_v26  ;;  %v3386_v60 = vld [vmem:[%s5739_s21 + $0x160] sm:$0xff]  ;;  %v3420_v54 = vld [vmem:[%s5739_s21 + $0x1e8] sm:$0xff] }
 0x1f7   : > { %3369 = vst [vmem:[%s5945_s29 + $0x218] sm:$0xff] %v3368_v28  ;;  %3371 = vst [vmem:[%s5945_s29 + $0x220] sm:$0xff] %v3370_v34  ;;  %v3418_v48 = vld [vmem:[%s5739_s21 + $0x1e0] sm:$0xff] }
 0x1f8   : > { %3373 = vst [vmem:[%s5945_s29 + $0x228] sm:$0xff] %v3372_v38  ;;  %3375 = vst [vmem:[%s5945_s29 + $0x230] sm:$0xff] %v3374_v39 }
 0x1f9   : > { %3377 = vst [vmem:[%s5945_s29 + $0x238] sm:$0xff] %v3376_v50  ;;  %3379 = vst [vmem:[%s5945_s29 + $0x240] sm:$0xff] %v3378_v51  ;;  %v3392_v31 = vld [vmem:[%s5739_s21 + $0x178] sm:$0xff] }
 0x1fa   : > { %3381 = vst [vmem:[%s5945_s29 + $0x248] sm:$0xff] %v3380_v52  ;;  %3383 = vst [vmem:[%s5945_s29 + $0x250] sm:$0xff] %v3382_v56  ;;  %v3390_v7 = vld [vmem:[%s5739_s21 + $0x170] sm:$0xff]  ;;  %v3424_v59 = vld [vmem:[%s5739_s21 + $0x1f8] sm:$0xff] }
 0x1fb   : > { %3385 = vst [vmem:[%s5945_s29 + $0x258] sm:$0xff] %v3384_v57  ;;  %3387 = vst [vmem:[%s5945_s29 + $0x260] sm:$0xff] %v3386_v60  ;;  %v3422_v58 = vld [vmem:[%s5739_s21 + $0x1f0] sm:$0xff] }
 0x1fc   : > { %3389 = vst [vmem:[%s5945_s29 + $0x268] sm:$0xff] %v3388_v61  ;;  %3391 = vst [vmem:[%s5945_s29 + $0x270] sm:$0xff] %v3390_v7 }
 0x1fd   : > { %3393 = vst [vmem:[%s5945_s29 + $0x278] sm:$0xff] %v3392_v31  ;;  %3395 = vst [vmem:[%s5945_s29 + $0x300] sm:$0xff] %v3394_v42 }
 0x1fe   : > { %3397 = vst [vmem:[%s5945_s29 + $0x308] sm:$0xff] %v3396_v11  ;;  %3399 = vst [vmem:[%s5945_s29 + $0x310] sm:$0xff] %v3398_v12 }
 0x1ff   : > { %3401 = vst [vmem:[%s5945_s29 + $0x318] sm:$0xff] %v3400_v22  ;;  %3403 = vst [vmem:[%s5945_s29 + $0x320] sm:$0xff] %v3402_v23 }
 0x200   : > { %3405 = vst [vmem:[%s5945_s29 + $0x328] sm:$0xff] %v3404_v27  ;;  %3407 = vst [vmem:[%s5945_s29 + $0x330] sm:$0xff] %v3406_v29 }
 0x201   : > { %3409 = vst [vmem:[%s5945_s29 + $0x338] sm:$0xff] %v3408_v35  ;;  %3411 = vst [vmem:[%s5945_s29 + $0x340] sm:$0xff] %v3410_v37 }
 0x202   : > { %3413 = vst [vmem:[%s5945_s29 + $0x348] sm:$0xff] %v3412_v43  ;;  %3415 = vst [vmem:[%s5945_s29 + $0x350] sm:$0xff] %v3414_v46 }
 0x203   : > { %3417 = vst [vmem:[%s5945_s29 + $0x358] sm:$0xff] %v3416_v47  ;;  %3419 = vst [vmem:[%s5945_s29 + $0x360] sm:$0xff] %v3418_v48 }
 0x204   : > { %3421 = vst [vmem:[%s5945_s29 + $0x368] sm:$0xff] %v3420_v54  ;;  %3423 = vst [vmem:[%s5945_s29 + $0x370] sm:$0xff] %v3422_v58 }
 0x205   : > { %3425 = vst [vmem:[%s5945_s29 + $0x378] sm:$0xff] %v3424_v59 }
 0x206 PF: > { %s13_s18 = sadd.s32 1, %s4840_s18   ;;  %s6092_s12 = smov %s4820_s13 }
 0x207   : > { %p10_p10 = scmp.ge.s32.totalorder %s13_s18, 6   ;;  %s6093_s13 = smov %s4919_s27 }
 0x208   : > { %s6094_s14 = smov %s4832_s16  ;;  %s6095_s15 = smov %s4836_s17 }
 0x209   : > { %s6096_s16 = smov %s6099_s19  ;;  %s6097_s17 = smov %s6103_s20 }
 0x20a   :  { %12 = sbr.rel (!%p10_p10) target bundleno = 4 (0x4), region = 119 }

</bundles_post_ra>
